<compile_context>
chip_gen: v7x
topology: tpu7x:2x2x1
jax: 0.10.0
libtpu: 0.0.40
codegen_flags: <defaults>
</compile_context>

<pallas_src>
import functools

import jax
import jax.numpy as jnp
import numpy as np
from jax.experimental import pallas as pl
from jax.experimental.pallas import tpu as pltpu


# ----------------------------------------------------------------------------
# Pallas kernel: all transformer layers, one row-block of tokens per grid step
# ----------------------------------------------------------------------------
def _transformer_kernel(x_ref, ln1g_ref, ln1b_ref, wqkv_ref, wo_ref, bout_ref,
                        ln2g_ref, ln2b_ref, w1_ref, b1_ref, w2_ref, b2_ref,
                        o_ref, act_ref, *,
                        batch_block, seq_len, heads, dim_head, compute_dtype):
    eps = 1e-5                      # nn.LayerNorm default
    inv_sqrt2 = 0.7071067811865476  # exact GELU constant
    cdt = compute_dtype
    inner = heads * dim_head

    d = pl.program_id(1)            # depth (layer) index, "arbitrary" axis
    n_layers = pl.num_programs(1)

    # Load the activation into the resident VMEM scratch on the first layer.
    @pl.when(d == 0)
    def _():
        act_ref[...] = x_ref[...]

    x = act_ref[...]                # (R, D) f32, R = batch_block * seq_len
    R, D = x.shape

    def layernorm(v, g, b):
        mu = jnp.mean(v, axis=-1, keepdims=True)
        var = jnp.mean((v - mu) ** 2, axis=-1, keepdims=True)
        return (v - mu) * jax.lax.rsqrt(var + eps) * g + b

    # ---------------- PreNorm + multi-head Attention ----------------
    xn = layernorm(x, ln1g_ref[...], ln1b_ref[...]).astype(cdt)          # (R, D)

    # Fused QKV projection: ONE lane-dense (R, D) x (D, 3*inner) MXU matmul.
    # (softmax scale already folded into the Q columns on the host)
    qkv = jnp.dot(xn, wqkv_ref[...], preferred_element_type=jnp.float32)  # (R, 3I)
    q = qkv[:, :inner]
    k = qkv[:, inner:2 * inner]
    v = qkv[:, 2 * inner:]

    # Attention per head: batched over batch_block; per-head output context is
    # immediately contracted against its W_out slice and accumulated on the
    # MXU, so no (H, R, D) intermediate and no VPU head-reduction.
    proj = jnp.zeros((R, D), jnp.float32)
    for h in range(heads):
        sl = slice(h * dim_head, (h + 1) * dim_head)
        qh = q[:, sl].reshape(batch_block, seq_len, dim_head).astype(cdt)
        kh = k[:, sl].reshape(batch_block, seq_len, dim_head).astype(cdt)
        vh = v[:, sl].reshape(batch_block, seq_len, dim_head).astype(cdt)

        # QK^T contracting the minor dims of both operands: no in-kernel k.T.
        dots = jnp.einsum('bnk,bmk->bnm', qh, kh,
                          preferred_element_type=jnp.float32)     # (bb, N, N)
        dots = dots - jnp.max(dots, axis=-1, keepdims=True)
        e = jnp.exp(dots)
        attn = e * pl.reciprocal(jnp.sum(e, axis=-1, keepdims=True),
                                 approx=True)
        oh = jnp.einsum('bnm,bmk->bnk', attn.astype(cdt), vh,
                        preferred_element_type=jnp.float32)       # (bb, N, K)
        oh = oh.reshape(R, dim_head).astype(cdt)                  # (R, K)

        # Head h's slice of the output projection (lane-dense (R, D) output).
        proj = proj + jnp.dot(oh, wo_ref[h],
                              preferred_element_type=jnp.float32)

    y = proj + bout_ref[...] + x                                  # residual 1

    # ---------------- PreNorm + FeedForward ----------------
    yn = layernorm(y, ln2g_ref[...], ln2b_ref[...]).astype(cdt)
    h1 = jnp.dot(yn, w1_ref[...],
                 preferred_element_type=jnp.float32) + b1_ref[...]
    # exact GELU (nn.GELU default): 0.5*x*(1+erf(x/sqrt(2))), kept in f32
    h1 = 0.5 * h1 * (1.0 + jax.lax.erf(h1 * inv_sqrt2))
    ff = jnp.dot(h1.astype(cdt), w2_ref[...],
                 preferred_element_type=jnp.float32) + b2_ref[...]
    new_x = ff + y                                                # residual 2

    # Keep the residual stream resident except on the last layer (saves one
    # (R, D) f32 VMEM store per row tile on the final step).
    @pl.when(d < n_layers - 1)
    def _():
        act_ref[...] = new_x

    @pl.when(d == n_layers - 1)
    def _():
        o_ref[...] = new_x


# ----------------------------------------------------------------------------
# Wrapper: builds the pallas_call with lane/row-dense blocks + depth grid axis
# ----------------------------------------------------------------------------
def build_transformer_call(B, N, D, depth, heads, dim_head, mlp_dim,
                           *, batch_block=1, compute_dtype=jnp.bfloat16):
    assert B % batch_block == 0
    inner = heads * dim_head
    R = batch_block * N                       # rows per grid step
    row_tiles = B // batch_block              # keep >= 2 on v7x (2 TCs/chip)
    grid = (row_tiles, depth)                 # (parallel row-tiles, depth)

    def wspec(shape):
        # Per-layer weight: leading depth dim squeezed, indexed by layer d
        # (so next-layer weights prefetch behind the current layer's compute).
        n = len(shape)
        return pl.BlockSpec((None,) + tuple(shape),
                            lambda i, d, _n=n: (d,) + (0,) * _n)

    in_specs = [
        pl.BlockSpec((R, D), lambda i, d: (i, 0)),        # x rows
        wspec((1, D)), wspec((1, D)),                     # ln1 gamma, beta
        wspec((D, 3 * inner)),                            # fused W_qkv (scale in Q)
        wspec((heads, dim_head, D)),                      # W_out as (H, K, D)
        wspec((1, D)),                                    # b_out
        wspec((1, D)), wspec((1, D)),                     # ln2 gamma, beta
        wspec((D, mlp_dim)), wspec((1, mlp_dim)),         # W1, b1
        wspec((mlp_dim, D)), wspec((1, D)),               # W2, b2
    ]
    out_spec = pl.BlockSpec((R, D), lambda i, d: (i, 0))

    # ---- VMEM budget: default scoped limit is only 16/32 MiB -------------
    wbytes = jnp.dtype(compute_dtype).itemsize
    per_layer_w = ((D * 3 * inner) + (inner * D) + (D * mlp_dim) + (mlp_dim * D)) * wbytes \
                  + (6 * D + mlp_dim) * 4                 # LN / bias vectors (f32)
    act_block = R * D * 4
    intermediates = R * (3 * inner + mlp_dim + 4 * D) * 4  # qkv, h1, y, new_x, ...
    need = 2 * per_layer_w + 5 * act_block + intermediates  # 2x = double-buffered
    vmem_limit = int(min(max(int(need * 1.5), 32 * 1024 * 1024),
                         64 * 1024 * 1024))               # stay within v7x's 64 MiB

    # ---- advisory cost estimate for the whole fused call ------------------
    flops_block_layer = (2 * R * D * 3 * inner            # fused QKV projection
                         + 4 * R * N * inner              # QK^T + attn @ V
                         + 2 * R * inner * D              # output projection
                         + 4 * R * D * mlp_dim)           # FFN
    cost = pl.CostEstimate(
        flops=row_tiles * depth * flops_block_layer,
        transcendentals=row_tiles * depth * (batch_block * heads * N * N + R * mlp_dim),
        bytes_accessed=2 * B * N * D * 4 + row_tiles * depth * per_layer_w)

    kernel = functools.partial(_transformer_kernel,
                               batch_block=batch_block, seq_len=N,
                               heads=heads, dim_head=dim_head,
                               compute_dtype=compute_dtype)
    return pl.pallas_call(
        kernel,
        out_shape=jax.ShapeDtypeStruct((B * N, D), jnp.float32),
        grid=grid,
        in_specs=in_specs,
        out_specs=out_spec,
        scratch_shapes=[pltpu.VMEM((R, D), jnp.float32)],  # resident activation
        compiler_params=pltpu.CompilerParams(
            dimension_semantics=("parallel", "arbitrary"),
            vmem_limit_bytes=vmem_limit),
        cost_estimate=cost,
    )


def _prepare_stacked_params(params, heads, dim_head, weight_dtype):
    """Host-side re-layout: fused W_qkv with the softmax scale folded into the
    Q columns, W_out as (H, dim_head, D), matmul weights cast to weight_dtype,
    depth stacked on a leading axis."""
    inner = heads * dim_head
    scale = dim_head ** (-0.5)
    wqkv, wo = [], []
    for p in params:
        w = p["w_qkv"]                                      # (D, 3*inner)
        w = jnp.concatenate([w[:, :inner] * scale, w[:, inner:]], axis=1)
        wqkv.append(w)
        wo.append(p["w_out"].reshape(heads, dim_head, -1))  # (H, K, D)

    stk = lambda xs, dt: jnp.stack(xs, axis=0).astype(dt)
    pick = lambda name, dt: jnp.stack([p[name] for p in params], 0).astype(dt)
    wdt = weight_dtype
    return [
        pick("ln1_g", jnp.float32), pick("ln1_b", jnp.float32),
        stk(wqkv, wdt), stk(wo, wdt),
        pick("b_out", jnp.float32),
        pick("ln2_g", jnp.float32), pick("ln2_b", jnp.float32),
        pick("w1", wdt), pick("b1", jnp.float32),
        pick("w2", wdt), pick("b2", jnp.float32),
    ]


def transformer_forward(x, params, heads, dim_head, mlp_dim,
                        *, batch_block=1, compute_dtype=jnp.bfloat16):
    B, N, D = x.shape
    depth = len(params)
    stacked = _prepare_stacked_params(params, heads, dim_head, compute_dtype)
    call = build_transformer_call(B, N, D, depth, heads, dim_head, mlp_dim,
                                  batch_block=batch_block,
                                  compute_dtype=compute_dtype)
    out = call(x.reshape(B * N, D).astype(jnp.float32), *stacked)
    return out.reshape(B, N, D)


# ----------------------------------------------------------------------------
# Pure-JAX reference (mirrors the PyTorch forward exactly, f32)
# ----------------------------------------------------------------------------
def _ref_layernorm(x, g, b, eps=1e-5):
    mu = jnp.mean(x, axis=-1, keepdims=True)
    var = jnp.mean((x - mu) ** 2, axis=-1, keepdims=True)
    return (x - mu) / jnp.sqrt(var + eps) * g + b


def ref_forward(x, layer_params, heads, dim_head):
    inner = heads * dim_head
    scale = dim_head ** (-0.5)
    for p in layer_params:
        xn = _ref_layernorm(x, p["ln1_g"][0], p["ln1_b"][0])
        qkv = xn @ p["w_qkv"]
        q, k, v = jnp.split(qkv, 3, axis=-1)
        B, N, _ = x.shape
        reshape = lambda t: t.reshape(B, N, heads, dim_head).transpose(0, 2, 1, 3)
        q, k, v = reshape(q), reshape(k), reshape(v)
        dots = jnp.einsum("bhnd,bhmd->bhnm", q, k) * scale
        attn = jax.nn.softmax(dots, axis=-1)
        out = jnp.einsum("bhnm,bhmd->bhnd", attn, v)
        out = out.transpose(0, 2, 1, 3).reshape(B, N, inner)
        x = out @ p["w_out"] + p["b_out"][0] + x
        yn = _ref_layernorm(x, p["ln2_g"][0], p["ln2_b"][0])
        h1 = jax.nn.gelu(yn @ p["w1"] + p["b1"][0], approximate=False)
        x = h1 @ p["w2"] + p["b2"][0] + x
    return x


# ----------------------------------------------------------------------------
# Deterministic parameter construction (PyTorch layout)
# ----------------------------------------------------------------------------
def make_params(key, depth, dim, heads, dim_head, mlp_dim):
    inner = heads * dim_head
    params = []
    for _ in range(depth):
        keys = jax.random.split(key, 8)
        key = keys[0]
        params.append({
            "ln1_g": jnp.ones((1, dim), jnp.float32),
            "ln1_b": jnp.zeros((1, dim), jnp.float32),
            "w_qkv": 0.05 * jax.random.normal(keys[1], (dim, 3 * inner), jnp.float32),
            "w_out": 0.05 * jax.random.normal(keys[2], (inner, dim), jnp.float32),
            "b_out": 0.01 * jax.random.normal(keys[3], (1, dim), jnp.float32),
            "ln2_g": jnp.ones((1, dim), jnp.float32),
            "ln2_b": jnp.zeros((1, dim), jnp.float32),
            "w1": 0.05 * jax.random.normal(keys[4], (dim, mlp_dim), jnp.float32),
            "b1": 0.01 * jax.random.normal(keys[5], (1, mlp_dim), jnp.float32),
            "w2": 0.05 * jax.random.normal(keys[6], (mlp_dim, dim), jnp.float32),
            "b2": 0.01 * jax.random.normal(keys[7], (1, dim), jnp.float32),
        })
    return params


if __name__ == "__main__":
    # small config consistent with the module's constructor
    B, N = 2, 8
    dim, depth, heads, dim_head, mlp_dim = 32, 2, 4, 16, 64

    key = jax.random.PRNGKey(0)
    kx, kp = jax.random.split(key)
    x = jax.random.normal(kx, (B, N, dim), jnp.float32)
    params = make_params(kp, depth, dim, heads, dim_head, mlp_dim)

    ref = ref_forward(x, params, heads, dim_head)

    # 1) f32 MXU operands: tight semantics check against the PyTorch-equivalent
    #    reference (approx reciprocal in softmax is the only extra rounding).
    out_f32 = transformer_forward(x, params, heads, dim_head, mlp_dim,
                                  batch_block=1, compute_dtype=jnp.float32)
    out_f32 = jax.block_until_ready(out_f32)
    np.testing.assert_allclose(np.asarray(out_f32), np.asarray(ref),
                               rtol=1e-3, atol=1e-3)

    # 2) bf16 MXU operands (f32 accumulation, f32 elementwise): fast path.
    out_bf16 = transformer_forward(x, params, heads, dim_head, mlp_dim,
                                   batch_block=1, compute_dtype=jnp.bfloat16)
    out_bf16 = jax.block_until_ready(out_bf16)
    np.testing.assert_allclose(np.asarray(out_bf16), np.asarray(ref),
                               rtol=2e-2, atol=2e-2)

    print("KERNEL_OK")
</pallas_src>

<mosaic_0001>
module attributes {stable_mosaic.version = 11 : i64} {
  func.func @_transformer_kernel(%arg0: i32, %arg1: i32, %arg2: memref<8x32xf32, #tpu.memory_space<vmem>>, %arg3: memref<1x1x32xf32, #tpu.memory_space<vmem>>, %arg4: memref<1x1x32xf32, #tpu.memory_space<vmem>>, %arg5: memref<1x32x192xf32, #tpu.memory_space<vmem>>, %arg6: memref<1x4x16x32xf32, #tpu.memory_space<vmem>>, %arg7: memref<1x1x32xf32, #tpu.memory_space<vmem>>, %arg8: memref<1x1x32xf32, #tpu.memory_space<vmem>>, %arg9: memref<1x1x32xf32, #tpu.memory_space<vmem>>, %arg10: memref<1x32x64xf32, #tpu.memory_space<vmem>>, %arg11: memref<1x1x64xf32, #tpu.memory_space<vmem>>, %arg12: memref<1x64x32xf32, #tpu.memory_space<vmem>>, %arg13: memref<1x1x32xf32, #tpu.memory_space<vmem>>, %arg14: memref<8x32xf32, #tpu.memory_space<vmem>>, %arg15: memref<8x32xf32, #tpu.memory_space<vmem>>) attributes {dimension_semantics = [#tpu.dimension_semantics<parallel>, #tpu.dimension_semantics<arbitrary>], iteration_bounds = array<i64: 2, 2>, scalar_prefetch = 0 : i64, scratch_operands = 1 : i64, tpu.core_type = #tpu.core_type<tc>, window_params = [{transform_indices = @transform_0, window_bounds = array<i64: 8, 32>}, {transform_indices = @transform_1, window_bounds = array<i64: 1, 1, 32>}, {transform_indices = @transform_2, window_bounds = array<i64: 1, 1, 32>}, {transform_indices = @transform_3, window_bounds = array<i64: 1, 32, 192>}, {transform_indices = @transform_4, window_bounds = array<i64: 1, 4, 16, 32>}, {transform_indices = @transform_5, window_bounds = array<i64: 1, 1, 32>}, {transform_indices = @transform_6, window_bounds = array<i64: 1, 1, 32>}, {transform_indices = @transform_7, window_bounds = array<i64: 1, 1, 32>}, {transform_indices = @transform_8, window_bounds = array<i64: 1, 32, 64>}, {transform_indices = @transform_9, window_bounds = array<i64: 1, 1, 64>}, {transform_indices = @transform_10, window_bounds = array<i64: 1, 64, 32>}, {transform_indices = @transform_11, window_bounds = array<i64: 1, 1, 32>}, {transform_indices = @transform_12, window_bounds = array<i64: 8, 32>}]} {
    %c0_i32 = arith.constant 0 : i32
    %0 = arith.cmpi eq, %arg1, %c0_i32 : i32
    %1 = arith.extui %0 : i1 to i32
    %c0_i32_0 = arith.constant 0 : i32
    %2 = arith.cmpi ne, %1, %c0_i32_0 : i32
    scf.if %2 {
      %c0_84 = arith.constant 0 : index
      %c0_85 = arith.constant 0 : index
      %189 = vector.load %arg2[%c0_84, %c0_85] : memref<8x32xf32, #tpu.memory_space<vmem>>, vector<8x32xf32>
      %c0_86 = arith.constant 0 : index
      %c0_87 = arith.constant 0 : index
      %190 = vector.load %arg15[%c0_86, %c0_87] : memref<8x32xf32, #tpu.memory_space<vmem>>, vector<8x32xf32>
      tpu.vector_store %arg15[%c0_86, %c0_87], %189 {strides = array<i32>} : memref<8x32xf32, #tpu.memory_space<vmem>>, vector<8x32xf32>,
    } else {
    }
    %c0 = arith.constant 0 : index
    %c0_1 = arith.constant 0 : index
    %3 = vector.load %arg15[%c0, %c0_1] : memref<8x32xf32, #tpu.memory_space<vmem>>, vector<8x32xf32>
    %c0_2 = arith.constant 0 : index
    %c0_3 = arith.constant 0 : index
    %c0_4 = arith.constant 0 : index
    %4 = vector.load %arg3[%c0_2, %c0_3, %c0_4] : memref<1x1x32xf32, #tpu.memory_space<vmem>>, vector<1x1x32xf32>
    %5 = vector.shape_cast %4 : vector<1x1x32xf32> to vector<1x32xf32>
    %c0_5 = arith.constant 0 : index
    %c0_6 = arith.constant 0 : index
    %c0_7 = arith.constant 0 : index
    %6 = vector.load %arg4[%c0_5, %c0_6, %c0_7] : memref<1x1x32xf32, #tpu.memory_space<vmem>>, vector<1x1x32xf32>
    %7 = vector.shape_cast %6 : vector<1x1x32xf32> to vector<1x32xf32>
    %cst = arith.constant dense<0.000000e+00> : vector<8xf32>
    %8 = vector.multi_reduction <add>, %3, %cst [1] : vector<8x32xf32> to vector<8xf32>
    %9 = vector.shape_cast %8 : vector<8xf32> to vector<8x1xf32>
    %cst_8 = arith.constant 3.200000e+01 : f32
    %10 = vector.broadcast %cst_8 : f32 to vector<8x1xf32>
    %11 = arith.divf %9, %10 : vector<8x1xf32>
    %12 = vector.broadcast %11 : vector<8x1xf32> to vector<8x32xf32>
    %13 = arith.subf %3, %12 : vector<8x32xf32>
    %14 = arith.mulf %13, %13 : vector<8x32xf32>
    %cst_9 = arith.constant dense<0.000000e+00> : vector<8xf32>
    %15 = vector.multi_reduction <add>, %14, %cst_9 [1] : vector<8x32xf32> to vector<8xf32>
    %16 = vector.shape_cast %15 : vector<8xf32> to vector<8x1xf32>
    %cst_10 = arith.constant 3.200000e+01 : f32
    %17 = vector.broadcast %cst_10 : f32 to vector<8x1xf32>
    %18 = arith.divf %16, %17 : vector<8x1xf32>
    %19 = vector.broadcast %11 : vector<8x1xf32> to vector<8x32xf32>
    %20 = arith.subf %3, %19 : vector<8x32xf32>
    %cst_11 = arith.constant 9.99999974E-6 : f32
    %21 = vector.broadcast %cst_11 : f32 to vector<8x1xf32>
    %22 = arith.addf %18, %21 : vector<8x1xf32>
    %23 = math.rsqrt %22 : vector<8x1xf32>
    %24 = vector.broadcast %23 : vector<8x1xf32> to vector<8x32xf32>
    %25 = arith.mulf %20, %24 : vector<8x32xf32>
    %26 = vector.broadcast %5 : vector<1x32xf32> to vector<8x32xf32>
    %27 = arith.mulf %25, %26 : vector<8x32xf32>
    %28 = vector.broadcast %7 : vector<1x32xf32> to vector<8x32xf32>
    %29 = arith.addf %27, %28 : vector<8x32xf32>
    %c0_12 = arith.constant 0 : index
    %c0_13 = arith.constant 0 : index
    %c0_14 = arith.constant 0 : index
    %30 = vector.load %arg5[%c0_12, %c0_13, %c0_14] : memref<1x32x192xf32, #tpu.memory_space<vmem>>, vector<1x32x192xf32>
    %31 = vector.shape_cast %30 : vector<1x32x192xf32> to vector<32x192xf32>
    %cst_15 = arith.constant dense<0.000000e+00> : vector<8x192xf32>
    %32 = tpu.matmul %29, %31, %cst_15 {dimension_numbers = #tpu.dot_dimension_numbers<[1], [0], [0], [1], [0, 0, 1, 1], [], []>} : vector<8x32xf32>, vector<32x192xf32>, vector<8x192xf32> -> vector<8x192xf32>
    %33 = vector.extract_strided_slice %32 {offsets = [0, 0], sizes = [8, 64], strides = [1, 1]} : vector<8x192xf32> to vector<8x64xf32>
    %34 = vector.extract_strided_slice %32 {offsets = [0, 64], sizes = [8, 64], strides = [1, 1]} : vector<8x192xf32> to vector<8x64xf32>
    %35 = vector.extract_strided_slice %32 {offsets = [0, 128], sizes = [8, 64], strides = [1, 1]} : vector<8x192xf32> to vector<8x64xf32>
    %cst_16 = arith.constant 0.000000e+00 : f32
    %36 = vector.broadcast %cst_16 : f32 to vector<8x32xf32>
    %37 = vector.extract_strided_slice %33 {offsets = [0, 0], sizes = [8, 16], strides = [1, 1]} : vector<8x64xf32> to vector<8x16xf32>
    %38 = vector.shape_cast %37 : vector<8x16xf32> to vector<1x8x16xf32>
    %39 = vector.extract_strided_slice %34 {offsets = [0, 0], sizes = [8, 16], strides = [1, 1]} : vector<8x64xf32> to vector<8x16xf32>
    %40 = vector.shape_cast %39 : vector<8x16xf32> to vector<1x8x16xf32>
    %41 = vector.extract_strided_slice %35 {offsets = [0, 0], sizes = [8, 16], strides = [1, 1]} : vector<8x64xf32> to vector<8x16xf32>
    %42 = vector.shape_cast %41 : vector<8x16xf32> to vector<1x8x16xf32>
    "tpu.trace_start"() <{level = 10 : i32, message = "bnk,bmk->bnm"}> : () -> ()
    %cst_17 = arith.constant dense<0.000000e+00> : vector<1x8x8xf32>
    %43 = tpu.matmul %38, %40, %cst_17 {dimension_numbers = #tpu.dot_dimension_numbers<[2], [2], [1], [1], [0, 0, 0, 1, 1, 1], [0], [0]>} : vector<1x8x16xf32>, vector<1x8x16xf32>, vector<1x8x8xf32> -> vector<1x8x8xf32>
    "tpu.trace_stop"() : () -> ()
    %cst_18 = arith.constant dense<0xFF800000> : vector<1x8xf32>
    %44 = vector.multi_reduction <maximumf>, %43, %cst_18 [2] : vector<1x8x8xf32> to vector<1x8xf32>
    %45 = vector.shape_cast %44 : vector<1x8xf32> to vector<1x8x1xf32>
    %46 = vector.broadcast %45 : vector<1x8x1xf32> to vector<1x8x8xf32>
    %47 = arith.subf %43, %46 : vector<1x8x8xf32>
    %48 = math.exp %47 : vector<1x8x8xf32>
    %cst_19 = arith.constant dense<0.000000e+00> : vector<1x8xf32>
    %49 = vector.multi_reduction <add>, %48, %cst_19 [2] : vector<1x8x8xf32> to vector<1x8xf32>
    %50 = vector.shape_cast %49 : vector<1x8xf32> to vector<1x8x1xf32>
    %51 = tpu.reciprocal %50 {approx = true} : vector<1x8x1xf32> -> vector<1x8x1xf32>
    %52 = vector.broadcast %51 : vector<1x8x1xf32> to vector<1x8x8xf32>
    %53 = arith.mulf %48, %52 : vector<1x8x8xf32>
    "tpu.trace_start"() <{level = 10 : i32, message = "bnm,bmk->bnk"}> : () -> ()
    %cst_20 = arith.constant dense<0.000000e+00> : vector<1x8x16xf32>
    %54 = tpu.matmul %53, %42, %cst_20 {dimension_numbers = #tpu.dot_dimension_numbers<[2], [1], [1], [2], [0, 0, 0, 1, 1, 2], [0], [0]>} : vector<1x8x8xf32>, vector<1x8x16xf32>, vector<1x8x16xf32> -> vector<1x8x16xf32>
    "tpu.trace_stop"() : () -> ()
    %55 = vector.shape_cast %54 : vector<1x8x16xf32> to vector<8x16xf32>
    %c0_21 = arith.constant 0 : index
    %c0_22 = arith.constant 0 : index
    %c0_23 = arith.constant 0 : index
    %c0_24 = arith.constant 0 : index
    %56 = vector.load %arg6[%c0_21, %c0_22, %c0_23, %c0_24] : memref<1x4x16x32xf32, #tpu.memory_space<vmem>>, vector<1x1x16x32xf32>
    %57 = vector.shape_cast %56 : vector<1x1x16x32xf32> to vector<16x32xf32>
    %cst_25 = arith.constant dense<0.000000e+00> : vector<8x32xf32>
    %58 = tpu.matmul %55, %57, %cst_25 {dimension_numbers = #tpu.dot_dimension_numbers<[1], [0], [0], [1], [0, 0, 1, 1], [], []>} : vector<8x16xf32>, vector<16x32xf32>, vector<8x32xf32> -> vector<8x32xf32>
    %59 = arith.addf %36, %58 : vector<8x32xf32>
    %60 = vector.extract_strided_slice %33 {offsets = [0, 16], sizes = [8, 16], strides = [1, 1]} : vector<8x64xf32> to vector<8x16xf32>
    %61 = vector.shape_cast %60 : vector<8x16xf32> to vector<1x8x16xf32>
    %62 = vector.extract_strided_slice %34 {offsets = [0, 16], sizes = [8, 16], strides = [1, 1]} : vector<8x64xf32> to vector<8x16xf32>
    %63 = vector.shape_cast %62 : vector<8x16xf32> to vector<1x8x16xf32>
    %64 = vector.extract_strided_slice %35 {offsets = [0, 16], sizes = [8, 16], strides = [1, 1]} : vector<8x64xf32> to vector<8x16xf32>
    %65 = vector.shape_cast %64 : vector<8x16xf32> to vector<1x8x16xf32>
    "tpu.trace_start"() <{level = 10 : i32, message = "bnk,bmk->bnm"}> : () -> ()
    %cst_26 = arith.constant dense<0.000000e+00> : vector<1x8x8xf32>
    %66 = tpu.matmul %61, %63, %cst_26 {dimension_numbers = #tpu.dot_dimension_numbers<[2], [2], [1], [1], [0, 0, 0, 1, 1, 1], [0], [0]>} : vector<1x8x16xf32>, vector<1x8x16xf32>, vector<1x8x8xf32> -> vector<1x8x8xf32>
    "tpu.trace_stop"() : () -> ()
    %cst_27 = arith.constant dense<0xFF800000> : vector<1x8xf32>
    %67 = vector.multi_reduction <maximumf>, %66, %cst_27 [2] : vector<1x8x8xf32> to vector<1x8xf32>
    %68 = vector.shape_cast %67 : vector<1x8xf32> to vector<1x8x1xf32>
    %69 = vector.broadcast %68 : vector<1x8x1xf32> to vector<1x8x8xf32>
    %70 = arith.subf %66, %69 : vector<1x8x8xf32>
    %71 = math.exp %70 : vector<1x8x8xf32>
    %cst_28 = arith.constant dense<0.000000e+00> : vector<1x8xf32>
    %72 = vector.multi_reduction <add>, %71, %cst_28 [2] : vector<1x8x8xf32> to vector<1x8xf32>
    %73 = vector.shape_cast %72 : vector<1x8xf32> to vector<1x8x1xf32>
    %74 = tpu.reciprocal %73 {approx = true} : vector<1x8x1xf32> -> vector<1x8x1xf32>
    %75 = vector.broadcast %74 : vector<1x8x1xf32> to vector<1x8x8xf32>
    %76 = arith.mulf %71, %75 : vector<1x8x8xf32>
    "tpu.trace_start"() <{level = 10 : i32, message = "bnm,bmk->bnk"}> : () -> ()
    %cst_29 = arith.constant dense<0.000000e+00> : vector<1x8x16xf32>
    %77 = tpu.matmul %76, %65, %cst_29 {dimension_numbers = #tpu.dot_dimension_numbers<[2], [1], [1], [2], [0, 0, 0, 1, 1, 2], [0], [0]>} : vector<1x8x8xf32>, vector<1x8x16xf32>, vector<1x8x16xf32> -> vector<1x8x16xf32>
    "tpu.trace_stop"() : () -> ()
    %78 = vector.shape_cast %77 : vector<1x8x16xf32> to vector<8x16xf32>
    %c0_30 = arith.constant 0 : index
    %c1 = arith.constant 1 : index
    %c0_31 = arith.constant 0 : index
    %c0_32 = arith.constant 0 : index
    %79 = vector.load %arg6[%c0_30, %c1, %c0_31, %c0_32] : memref<1x4x16x32xf32, #tpu.memory_space<vmem>>, vector<1x1x16x32xf32>
    %80 = vector.shape_cast %79 : vector<1x1x16x32xf32> to vector<16x32xf32>
    %cst_33 = arith.constant dense<0.000000e+00> : vector<8x32xf32>
    %81 = tpu.matmul %78, %80, %cst_33 {dimension_numbers = #tpu.dot_dimension_numbers<[1], [0], [0], [1], [0, 0, 1, 1], [], []>} : vector<8x16xf32>, vector<16x32xf32>, vector<8x32xf32> -> vector<8x32xf32>
    %82 = arith.addf %59, %81 : vector<8x32xf32>
    %83 = vector.extract_strided_slice %33 {offsets = [0, 32], sizes = [8, 16], strides = [1, 1]} : vector<8x64xf32> to vector<8x16xf32>
    %84 = vector.shape_cast %83 : vector<8x16xf32> to vector<1x8x16xf32>
    %85 = vector.extract_strided_slice %34 {offsets = [0, 32], sizes = [8, 16], strides = [1, 1]} : vector<8x64xf32> to vector<8x16xf32>
    %86 = vector.shape_cast %85 : vector<8x16xf32> to vector<1x8x16xf32>
    %87 = vector.extract_strided_slice %35 {offsets = [0, 32], sizes = [8, 16], strides = [1, 1]} : vector<8x64xf32> to vector<8x16xf32>
    %88 = vector.shape_cast %87 : vector<8x16xf32> to vector<1x8x16xf32>
    "tpu.trace_start"() <{level = 10 : i32, message = "bnk,bmk->bnm"}> : () -> ()
    %cst_34 = arith.constant dense<0.000000e+00> : vector<1x8x8xf32>
    %89 = tpu.matmul %84, %86, %cst_34 {dimension_numbers = #tpu.dot_dimension_numbers<[2], [2], [1], [1], [0, 0, 0, 1, 1, 1], [0], [0]>} : vector<1x8x16xf32>, vector<1x8x16xf32>, vector<1x8x8xf32> -> vector<1x8x8xf32>
    "tpu.trace_stop"() : () -> ()
    %cst_35 = arith.constant dense<0xFF800000> : vector<1x8xf32>
    %90 = vector.multi_reduction <maximumf>, %89, %cst_35 [2] : vector<1x8x8xf32> to vector<1x8xf32>
    %91 = vector.shape_cast %90 : vector<1x8xf32> to vector<1x8x1xf32>
    %92 = vector.broadcast %91 : vector<1x8x1xf32> to vector<1x8x8xf32>
    %93 = arith.subf %89, %92 : vector<1x8x8xf32>
    %94 = math.exp %93 : vector<1x8x8xf32>
    %cst_36 = arith.constant dense<0.000000e+00> : vector<1x8xf32>
    %95 = vector.multi_reduction <add>, %94, %cst_36 [2] : vector<1x8x8xf32> to vector<1x8xf32>
    %96 = vector.shape_cast %95 : vector<1x8xf32> to vector<1x8x1xf32>
    %97 = tpu.reciprocal %96 {approx = true} : vector<1x8x1xf32> -> vector<1x8x1xf32>
    %98 = vector.broadcast %97 : vector<1x8x1xf32> to vector<1x8x8xf32>
    %99 = arith.mulf %94, %98 : vector<1x8x8xf32>
    "tpu.trace_start"() <{level = 10 : i32, message = "bnm,bmk->bnk"}> : () -> ()
    %cst_37 = arith.constant dense<0.000000e+00> : vector<1x8x16xf32>
    %100 = tpu.matmul %99, %88, %cst_37 {dimension_numbers = #tpu.dot_dimension_numbers<[2], [1], [1], [2], [0, 0, 0, 1, 1, 2], [0], [0]>} : vector<1x8x8xf32>, vector<1x8x16xf32>, vector<1x8x16xf32> -> vector<1x8x16xf32>
    "tpu.trace_stop"() : () -> ()
    %101 = vector.shape_cast %100 : vector<1x8x16xf32> to vector<8x16xf32>
    %c0_38 = arith.constant 0 : index
    %c2 = arith.constant 2 : index
    %c0_39 = arith.constant 0 : index
    %c0_40 = arith.constant 0 : index
    %102 = vector.load %arg6[%c0_38, %c2, %c0_39, %c0_40] : memref<1x4x16x32xf32, #tpu.memory_space<vmem>>, vector<1x1x16x32xf32>
    %103 = vector.shape_cast %102 : vector<1x1x16x32xf32> to vector<16x32xf32>
    %cst_41 = arith.constant dense<0.000000e+00> : vector<8x32xf32>
    %104 = tpu.matmul %101, %103, %cst_41 {dimension_numbers = #tpu.dot_dimension_numbers<[1], [0], [0], [1], [0, 0, 1, 1], [], []>} : vector<8x16xf32>, vector<16x32xf32>, vector<8x32xf32> -> vector<8x32xf32>
    %105 = arith.addf %82, %104 : vector<8x32xf32>
    %106 = vector.extract_strided_slice %33 {offsets = [0, 48], sizes = [8, 16], strides = [1, 1]} : vector<8x64xf32> to vector<8x16xf32>
    %107 = vector.shape_cast %106 : vector<8x16xf32> to vector<1x8x16xf32>
    %108 = vector.extract_strided_slice %34 {offsets = [0, 48], sizes = [8, 16], strides = [1, 1]} : vector<8x64xf32> to vector<8x16xf32>
    %109 = vector.shape_cast %108 : vector<8x16xf32> to vector<1x8x16xf32>
    %110 = vector.extract_strided_slice %35 {offsets = [0, 48], sizes = [8, 16], strides = [1, 1]} : vector<8x64xf32> to vector<8x16xf32>
    %111 = vector.shape_cast %110 : vector<8x16xf32> to vector<1x8x16xf32>
    "tpu.trace_start"() <{level = 10 : i32, message = "bnk,bmk->bnm"}> : () -> ()
    %cst_42 = arith.constant dense<0.000000e+00> : vector<1x8x8xf32>
    %112 = tpu.matmul %107, %109, %cst_42 {dimension_numbers = #tpu.dot_dimension_numbers<[2], [2], [1], [1], [0, 0, 0, 1, 1, 1], [0], [0]>} : vector<1x8x16xf32>, vector<1x8x16xf32>, vector<1x8x8xf32> -> vector<1x8x8xf32>
    "tpu.trace_stop"() : () -> ()
    %cst_43 = arith.constant dense<0xFF800000> : vector<1x8xf32>
    %113 = vector.multi_reduction <maximumf>, %112, %cst_43 [2] : vector<1x8x8xf32> to vector<1x8xf32>
    %114 = vector.shape_cast %113 : vector<1x8xf32> to vector<1x8x1xf32>
    %115 = vector.broadcast %114 : vector<1x8x1xf32> to vector<1x8x8xf32>
    %116 = arith.subf %112, %115 : vector<1x8x8xf32>
    %117 = math.exp %116 : vector<1x8x8xf32>
    %cst_44 = arith.constant dense<0.000000e+00> : vector<1x8xf32>
    %118 = vector.multi_reduction <add>, %117, %cst_44 [2] : vector<1x8x8xf32> to vector<1x8xf32>
    %119 = vector.shape_cast %118 : vector<1x8xf32> to vector<1x8x1xf32>
    %120 = tpu.reciprocal %119 {approx = true} : vector<1x8x1xf32> -> vector<1x8x1xf32>
    %121 = vector.broadcast %120 : vector<1x8x1xf32> to vector<1x8x8xf32>
    %122 = arith.mulf %117, %121 : vector<1x8x8xf32>
    "tpu.trace_start"() <{level = 10 : i32, message = "bnm,bmk->bnk"}> : () -> ()
    %cst_45 = arith.constant dense<0.000000e+00> : vector<1x8x16xf32>
    %123 = tpu.matmul %122, %111, %cst_45 {dimension_numbers = #tpu.dot_dimension_numbers<[2], [1], [1], [2], [0, 0, 0, 1, 1, 2], [0], [0]>} : vector<1x8x8xf32>, vector<1x8x16xf32>, vector<1x8x16xf32> -> vector<1x8x16xf32>
    "tpu.trace_stop"() : () -> ()
    %124 = vector.shape_cast %123 : vector<1x8x16xf32> to vector<8x16xf32>
    %c0_46 = arith.constant 0 : index
    %c3 = arith.constant 3 : index
    %c0_47 = arith.constant 0 : index
    %c0_48 = arith.constant 0 : index
    %125 = vector.load %arg6[%c0_46, %c3, %c0_47, %c0_48] : memref<1x4x16x32xf32, #tpu.memory_space<vmem>>, vector<1x1x16x32xf32>
    %126 = vector.shape_cast %125 : vector<1x1x16x32xf32> to vector<16x32xf32>
    %cst_49 = arith.constant dense<0.000000e+00> : vector<8x32xf32>
    %127 = tpu.matmul %124, %126, %cst_49 {dimension_numbers = #tpu.dot_dimension_numbers<[1], [0], [0], [1], [0, 0, 1, 1], [], []>} : vector<8x16xf32>, vector<16x32xf32>, vector<8x32xf32> -> vector<8x32xf32>
    %128 = arith.addf %105, %127 : vector<8x32xf32>
    %c0_50 = arith.constant 0 : index
    %c0_51 = arith.constant 0 : index
    %c0_52 = arith.constant 0 : index
    %129 = vector.load %arg7[%c0_50, %c0_51, %c0_52] : memref<1x1x32xf32, #tpu.memory_space<vmem>>, vector<1x1x32xf32>
    %130 = vector.shape_cast %129 : vector<1x1x32xf32> to vector<1x32xf32>
    %131 = vector.broadcast %130 : vector<1x32xf32> to vector<8x32xf32>
    %132 = arith.addf %128, %131 : vector<8x32xf32>
    %133 = arith.addf %132, %3 : vector<8x32xf32>
    %c0_53 = arith.constant 0 : index
    %c0_54 = arith.constant 0 : index
    %c0_55 = arith.constant 0 : index
    %134 = vector.load %arg8[%c0_53, %c0_54, %c0_55] : memref<1x1x32xf32, #tpu.memory_space<vmem>>, vector<1x1x32xf32>
    %135 = vector.shape_cast %134 : vector<1x1x32xf32> to vector<1x32xf32>
    %c0_56 = arith.constant 0 : index
    %c0_57 = arith.constant 0 : index
    %c0_58 = arith.constant 0 : index
    %136 = vector.load %arg9[%c0_56, %c0_57, %c0_58] : memref<1x1x32xf32, #tpu.memory_space<vmem>>, vector<1x1x32xf32>
    %137 = vector.shape_cast %136 : vector<1x1x32xf32> to vector<1x32xf32>
    %cst_59 = arith.constant dense<0.000000e+00> : vector<8xf32>
    %138 = vector.multi_reduction <add>, %133, %cst_59 [1] : vector<8x32xf32> to vector<8xf32>
    %139 = vector.shape_cast %138 : vector<8xf32> to vector<8x1xf32>
    %cst_60 = arith.constant 3.200000e+01 : f32
    %140 = vector.broadcast %cst_60 : f32 to vector<8x1xf32>
    %141 = arith.divf %139, %140 : vector<8x1xf32>
    %142 = vector.broadcast %141 : vector<8x1xf32> to vector<8x32xf32>
    %143 = arith.subf %133, %142 : vector<8x32xf32>
    %144 = arith.mulf %143, %143 : vector<8x32xf32>
    %cst_61 = arith.constant dense<0.000000e+00> : vector<8xf32>
    %145 = vector.multi_reduction <add>, %144, %cst_61 [1] : vector<8x32xf32> to vector<8xf32>
    %146 = vector.shape_cast %145 : vector<8xf32> to vector<8x1xf32>
    %cst_62 = arith.constant 3.200000e+01 : f32
    %147 = vector.broadcast %cst_62 : f32 to vector<8x1xf32>
    %148 = arith.divf %146, %147 : vector<8x1xf32>
    %149 = vector.broadcast %141 : vector<8x1xf32> to vector<8x32xf32>
    %150 = arith.subf %133, %149 : vector<8x32xf32>
    %cst_63 = arith.constant 9.99999974E-6 : f32
    %151 = vector.broadcast %cst_63 : f32 to vector<8x1xf32>
    %152 = arith.addf %148, %151 : vector<8x1xf32>
    %153 = math.rsqrt %152 : vector<8x1xf32>
    %154 = vector.broadcast %153 : vector<8x1xf32> to vector<8x32xf32>
    %155 = arith.mulf %150, %154 : vector<8x32xf32>
    %156 = vector.broadcast %135 : vector<1x32xf32> to vector<8x32xf32>
    %157 = arith.mulf %155, %156 : vector<8x32xf32>
    %158 = vector.broadcast %137 : vector<1x32xf32> to vector<8x32xf32>
    %159 = arith.addf %157, %158 : vector<8x32xf32>
    %c0_64 = arith.constant 0 : index
    %c0_65 = arith.constant 0 : index
    %c0_66 = arith.constant 0 : index
    %160 = vector.load %arg10[%c0_64, %c0_65, %c0_66] : memref<1x32x64xf32, #tpu.memory_space<vmem>>, vector<1x32x64xf32>
    %161 = vector.shape_cast %160 : vector<1x32x64xf32> to vector<32x64xf32>
    %cst_67 = arith.constant dense<0.000000e+00> : vector<8x64xf32>
    %162 = tpu.matmul %159, %161, %cst_67 {dimension_numbers = #tpu.dot_dimension_numbers<[1], [0], [0], [1], [0, 0, 1, 1], [], []>} : vector<8x32xf32>, vector<32x64xf32>, vector<8x64xf32> -> vector<8x64xf32>
    %c0_68 = arith.constant 0 : index
    %c0_69 = arith.constant 0 : index
    %c0_70 = arith.constant 0 : index
    %163 = vector.load %arg11[%c0_68, %c0_69, %c0_70] : memref<1x1x64xf32, #tpu.memory_space<vmem>>, vector<1x1x64xf32>
    %164 = vector.shape_cast %163 : vector<1x1x64xf32> to vector<1x64xf32>
    %165 = vector.broadcast %164 : vector<1x64xf32> to vector<8x64xf32>
    %166 = arith.addf %162, %165 : vector<8x64xf32>
    %cst_71 = arith.constant 5.000000e-01 : f32
    %167 = vector.broadcast %cst_71 : f32 to vector<8x64xf32>
    %168 = arith.mulf %167, %166 : vector<8x64xf32>
    %cst_72 = arith.constant 0.707106769 : f32
    %169 = vector.broadcast %cst_72 : f32 to vector<8x64xf32>
    %170 = arith.mulf %166, %169 : vector<8x64xf32>
    %171 = math.erf %170 : vector<8x64xf32>
    %cst_73 = arith.constant 1.000000e+00 : f32
    %172 = vector.broadcast %cst_73 : f32 to vector<8x64xf32>
    %173 = arith.addf %172, %171 : vector<8x64xf32>
    %174 = arith.mulf %168, %173 : vector<8x64xf32>
    %c0_74 = arith.constant 0 : index
    %c0_75 = arith.constant 0 : index
    %c0_76 = arith.constant 0 : index
    %175 = vector.load %arg12[%c0_74, %c0_75, %c0_76] : memref<1x64x32xf32, #tpu.memory_space<vmem>>, vector<1x64x32xf32>
    %176 = vector.shape_cast %175 : vector<1x64x32xf32> to vector<64x32xf32>
    %cst_77 = arith.constant dense<0.000000e+00> : vector<8x32xf32>
    %177 = tpu.matmul %174, %176, %cst_77 {dimension_numbers = #tpu.dot_dimension_numbers<[1], [0], [0], [1], [0, 0, 1, 1], [], []>} : vector<8x64xf32>, vector<64x32xf32>, vector<8x32xf32> -> vector<8x32xf32>
    %c0_78 = arith.constant 0 : index
    %c0_79 = arith.constant 0 : index
    %c0_80 = arith.constant 0 : index
    %178 = vector.load %arg13[%c0_78, %c0_79, %c0_80] : memref<1x1x32xf32, #tpu.memory_space<vmem>>, vector<1x1x32xf32>
    %179 = vector.shape_cast %178 : vector<1x1x32xf32> to vector<1x32xf32>
    %180 = vector.broadcast %179 : vector<1x32xf32> to vector<8x32xf32>
    %181 = arith.addf %177, %180 : vector<8x32xf32>
    %182 = arith.addf %181, %133 : vector<8x32xf32>
    %c1_i32 = arith.constant 1 : i32
    %183 = arith.cmpi slt, %arg1, %c1_i32 : i32
    %184 = arith.extui %183 : i1 to i32
    %c0_i32_81 = arith.constant 0 : i32
    %185 = arith.cmpi ne, %184, %c0_i32_81 : i32
    scf.if %185 {
      %c0_84 = arith.constant 0 : index
      %c0_85 = arith.constant 0 : index
      %189 = vector.load %arg15[%c0_84, %c0_85] : memref<8x32xf32, #tpu.memory_space<vmem>>, vector<8x32xf32>
      tpu.vector_store %arg15[%c0_84, %c0_85], %182 {strides = array<i32>} : memref<8x32xf32, #tpu.memory_space<vmem>>, vector<8x32xf32>,
    } else {
    }
    %c1_i32_82 = arith.constant 1 : i32
    %186 = arith.cmpi eq, %arg1, %c1_i32_82 : i32
    %187 = arith.extui %186 : i1 to i32
    %c0_i32_83 = arith.constant 0 : i32
    %188 = arith.cmpi ne, %187, %c0_i32_83 : i32
    scf.if %188 {
      %c0_84 = arith.constant 0 : index
      %c0_85 = arith.constant 0 : index
      %189 = vector.load %arg14[%c0_84, %c0_85] : memref<8x32xf32, #tpu.memory_space<vmem>>, vector<8x32xf32>
      tpu.vector_store %arg14[%c0_84, %c0_85], %182 {strides = array<i32>} : memref<8x32xf32, #tpu.memory_space<vmem>>, vector<8x32xf32>,
    } else {
    }
    return
  }
  func.func @transform_0(%arg0: i32, %arg1: i32) -> (i32, i32) {
    %c0_i32 = arith.constant 0 : i32
    %c0_i32_0 = arith.constant 0 : i32
    return %arg0, %c0_i32 : i32, i32
  }
  func.func @transform_1(%arg0: i32, %arg1: i32) -> (i32, i32, i32) {
    %c0_i32 = arith.constant 0 : i32
    %c0_i32_0 = arith.constant 0 : i32
    %c0_i32_1 = arith.constant 0 : i32
    return %arg1, %c0_i32, %c0_i32_0 : i32, i32, i32
  }
  func.func @transform_2(%arg0: i32, %arg1: i32) -> (i32, i32, i32) {
    %c0_i32 = arith.constant 0 : i32
    %c0_i32_0 = arith.constant 0 : i32
    %c0_i32_1 = arith.constant 0 : i32
    return %arg1, %c0_i32, %c0_i32_0 : i32, i32, i32
  }
  func.func @transform_3(%arg0: i32, %arg1: i32) -> (i32, i32, i32) {
    %c0_i32 = arith.constant 0 : i32
    %c0_i32_0 = arith.constant 0 : i32
    %c0_i32_1 = arith.constant 0 : i32
    return %arg1, %c0_i32, %c0_i32_0 : i32, i32, i32
  }
  func.func @transform_4(%arg0: i32, %arg1: i32) -> (i32, i32, i32, i32) {
    %c0_i32 = arith.constant 0 : i32
    %c0_i32_0 = arith.constant 0 : i32
    %c0_i32_1 = arith.constant 0 : i32
    %c0_i32_2 = arith.constant 0 : i32
    return %arg1, %c0_i32, %c0_i32_0, %c0_i32_1 : i32, i32, i32, i32
  }
  func.func @transform_5(%arg0: i32, %arg1: i32) -> (i32, i32, i32) {
    %c0_i32 = arith.constant 0 : i32
    %c0_i32_0 = arith.constant 0 : i32
    %c0_i32_1 = arith.constant 0 : i32
    return %arg1, %c0_i32, %c0_i32_0 : i32, i32, i32
  }
  func.func @transform_6(%arg0: i32, %arg1: i32) -> (i32, i32, i32) {
    %c0_i32 = arith.constant 0 : i32
    %c0_i32_0 = arith.constant 0 : i32
    %c0_i32_1 = arith.constant 0 : i32
    return %arg1, %c0_i32, %c0_i32_0 : i32, i32, i32
  }
  func.func @transform_7(%arg0: i32, %arg1: i32) -> (i32, i32, i32) {
    %c0_i32 = arith.constant 0 : i32
    %c0_i32_0 = arith.constant 0 : i32
    %c0_i32_1 = arith.constant 0 : i32
    return %arg1, %c0_i32, %c0_i32_0 : i32, i32, i32
  }
  func.func @transform_8(%arg0: i32, %arg1: i32) -> (i32, i32, i32) {
    %c0_i32 = arith.constant 0 : i32
    %c0_i32_0 = arith.constant 0 : i32
    %c0_i32_1 = arith.constant 0 : i32
    return %arg1, %c0_i32, %c0_i32_0 : i32, i32, i32
  }
  func.func @transform_9(%arg0: i32, %arg1: i32) -> (i32, i32, i32) {
    %c0_i32 = arith.constant 0 : i32
    %c0_i32_0 = arith.constant 0 : i32
    %c0_i32_1 = arith.constant 0 : i32
    return %arg1, %c0_i32, %c0_i32_0 : i32, i32, i32
  }
  func.func @transform_10(%arg0: i32, %arg1: i32) -> (i32, i32, i32) {
    %c0_i32 = arith.constant 0 : i32
    %c0_i32_0 = arith.constant 0 : i32
    %c0_i32_1 = arith.constant 0 : i32
    return %arg1, %c0_i32, %c0_i32_0 : i32, i32, i32
  }
  func.func @transform_11(%arg0: i32, %arg1: i32) -> (i32, i32, i32) {
    %c0_i32 = arith.constant 0 : i32
    %c0_i32_0 = arith.constant 0 : i32
    %c0_i32_1 = arith.constant 0 : i32
    return %arg1, %c0_i32, %c0_i32_0 : i32, i32, i32
  }
  func.func @transform_12(%arg0: i32, %arg1: i32) -> (i32, i32) {
    %c0_i32 = arith.constant 0 : i32
    %c0_i32_0 = arith.constant 0 : i32
    return %arg0, %c0_i32 : i32, i32
  }
}

</mosaic_0001>

<bundles_post_ra>
// kernel: tpu_custom_call.1
= control target key start
LH: loop header
LB: loop body
LE: loop exit
PB: predicated region body
PF: predicated region fallthrough
CT: control target
= control target key end

     0   :  { %s3331_s0 = inlined_call_operand.hbm [shape: f32[16,32], index: 0, kind: input, shape index: {}]   ;;  %s3332_s1 = inlined_call_operand.vmem [shape: f32[2,1,32], index: 1, kind: input, shape index: {}]   ;;  %s3333_s2 = inlined_call_operand.vmem [shape: f32[2,1,32], index: 2, kind: input, shape index: {}]   ;;  %s3334_s3 = inlined_call_operand.vmem [shape: f32[2,32,192], index: 3, kind: input, shape index: {}]   ;;  %s3335_s4 = inlined_call_operand.hbm [shape: f32[2,4,16,32], index: 4, kind: input, shape index: {}]   ;;  %s3336_s5 = inlined_call_operand.vmem [shape: f32[2,1,32], index: 5, kind: input, shape index: {}]   ;;  %s3337_s6 = inlined_call_operand.vmem [shape: f32[2,1,32], index: 6, kind: input, shape index: {}]   ;;  %s3338_s7 = inlined_call_operand.vmem [shape: f32[2,1,32], index: 7, kind: input, shape index: {}]   ;;  %s3339_s8 = inlined_call_operand.vmem [shape: f32[2,32,64], index: 8, kind: input, shape index: {}]   ;;  %s3340_s9 = inlined_call_operand.vmem [shape: f32[2,1,64], index: 9, kind: input, shape index: {}]   ;;  %s3341_s10 = inlined_call_operand.vmem [shape: f32[2,64,32], index: 10, kind: input, shape index: {}]   ;;  %s3342_s11 = inlined_call_operand.vmem [shape: f32[2,1,32], index: 11, kind: input, shape index: {}]   ;;  %s3343_s12 = inlined_call_operand.hbm [shape: f32[16,32], index: 12, kind: output, shape index: {}]  }
   0x1   :  { %3363 = sst [smem:[#allocation28_spill]] %s3331_s0 }
   0x2   :  { %3364 = sst [smem:[#allocation29_spill]] %s3334_s3 }
   0x3   :  { %3365 = sst [smem:[#allocation30_spill]] %s3335_s4 }
   0x4   :  { %3366 = sst [smem:[#allocation31_spill]] %s3339_s8 }
   0x5   :  { %3367 = sst [smem:[#allocation32_spill]] %s3340_s9 }
   0x6   :  { %3368 = sst [smem:[#allocation33_spill]] %s3341_s10 }
   0x7   :  { %3369 = sst [smem:[#allocation34_spill]] %s3342_s11 }
   0x8   :  { %3370 = sst [smem:[#allocation35_spill]] %s3343_s12 }
   0x9   :  { %17 = vsyncpa [#allocation4], 0 }
   0xa   :  { %19 = vsyncpa [#allocation4 + $0x1], 0 }
   0xb   :  { %20 = vsyncpa [#allocation7], 0 }
   0xc   :  { %22 = vsyncpa [#allocation7 + $0x1], 0 }
   0xd   :  { %23 = vsyncpa [#allocation5], 0 }
   0xe   :  { %25 = vsyncpa [#allocation5 + $0x1], 0  ;;  %s2817_s21 = smov 0   ;;  %s2819_s22 = smov 0  }
   0xf   :  { %s2821_s23 = smov 0   ;;  %s2823_s24 = smov 0  }
  0x10   :  { %s2825_s25 = smov 0   ;;  %s2827_s26 = smov 0  }
  0x11   :  { %s2829_s27 = smov 0   ;;  %s2831_s28 = smov 0  }
  0x12   :  { %s2833_s29 = smov 0   ;;  %s2835_s30 = smov 0  }
  0x13   :  { %s2837_s13 = smov 0  }
  0x14 LB: > { %3371 = sst [smem:[#allocation12_spill]] %s2699_s22  ;;  %s2168_s14 = sadd.s32 4294967295, %s2735_s13   ;;  %s2735_s13 = sphi %s2837_s13, %s31_s13   ;;  %s2731_s30 = sphi %s2835_s30, %s3432_s30   ;;  %s2727_s29 = sphi %s2833_s29, %s3431_s29   ;;  %s2723_s28 = sphi %s2831_s28, %s3430_s28   ;;  %s2719_s27 = sphi %s2829_s27, %s3429_s27   ;;  %s2715_s26 = sphi %s2827_s26, %s3428_s26   ;;  %s2711_s25 = sphi %s2825_s25, %s3427_s25   ;;  %s2707_s24 = sphi %s2823_s24, %s3426_s24   ;;  %s2703_s23 = sphi %s2821_s23, %s3425_s23   ;;  %s2699_s22 = sphi %s2819_s22, %s3424_s22   ;;  %s2695_s21 = sphi %s2817_s21, %s3423_s21  }
  0x15   : > { %3372 = sst [smem:[#allocation13_spill]] %s2703_s23  ;;  %s2169_s15 = sadd.s32 4294967294, %s2735_s13  }
  0x16   : > { %3373 = sst [smem:[#allocation14_spill]] %s2707_s24  ;;  %p57_p0 = scmp.ne.s32.totalorder %s2715_s26, %s2711_s25 }
  0x17   : > { %3374 = sst [smem:[#allocation15_spill]] %s2711_s25  ;;  %p58_p1 = scmp.eq.s32.totalorder %s2735_s13, 0 }
  0x18   : > { %3375 = sst [smem:[#allocation16_spill]] %s2715_s26  ;;  %p63_p2 = scmp.ne.s32.totalorder %s2711_s25, %s2707_s24 }
  0x19   : > { %3376 = sst [smem:[#allocation17_spill]] %s2723_s28  ;;  %p64_p3 = scmp.eq.s32.totalorder %s2168_s14, 0 }
  0x1a   : > { %3377 = sst [smem:[#allocation18_spill]] %s2727_s29  ;;  %p2879_p4 = por %p58_p1, %p57_p0 }
  0x1b   : > { %3378 = sst [smem:[#allocation19_spill]] %s2731_s30  ;;  %p161_p5 = scmp.ne.s32.totalorder %s2703_s23, %s2699_s22 }
  0x1c   : > { %3379 = sst [smem:[#allocation20_spill]] %s2735_s13  ;;  %p2885_p6 = por %p64_p3, %p63_p2 }
  0x1d   : > { %p167_p7 = scmp.ne.s32.totalorder %s2699_s22, %s2695_s21  ;;  %p2890_p8 = por %p161_p5, %p58_p1 }
  0x1e   : > { %s3381_s19 = scalar_select %p2885_p6, 1, 0 }
  0x1f   : > { %p373_p9 = scmp.eq.s32.totalorder %s2168_s14, 3  ;;  %p2894_p10 = por %p167_p7, %p64_p3 }
  0x20   : > { %p379_p11 = scmp.eq.s32.totalorder %s2169_s15, 3  ;;  %p2425_p1 = scmp.lt.s32.totalorder %s2735_s13, 4 }
  0x21   : > { %s3383_s17 = scalar_select %p2894_p10, 1, 0 }
  0x22   : > { %p2898_p12 = por %p373_p9, %p57_p0  ;;  %p2902_p13 = por %p379_p11, %p63_p2 }
  0x23   : > { %s399_s21 = sand.u32 1, %s2715_s26   ;;  %s2173_s12 = sshll.u32 %s2731_s30, 7 }
  0x24   : > { %s3384_s16 = scalar_select %p2898_p12, 1, 0 }
  0x25   : > { %s3386_s24 = scalar_select %p2902_p13, 1, 0 }
  0x26   : > { %3385 = sst [smem:[#allocation21_spill]] %s3384_s16  ;;  %s2172_s28 = sshll.u32 %s399_s21, 3 }
  0x27   : > { %3387 = sst [smem:[#allocation22_spill]] %s3386_s24  ;;  %s3388_s0 = sld [smem:[#allocation28_spill]] }
  0x28   : > { %s403_s15 = scalar_lea.vmem [#allocation3], %s2172_s28  ;;  %p2916_p0 = pnand %p2425_p1, %p2879_p4 }
  0x29   : > { %s410_s9 = sshll.u32 %s403_s15, 4  ;;  %p2924_p2 = pnand %p2425_p1, %p2890_p8  ;;  %s2920_s9 = int_to_ptr.vmem [resolvable:$true] %s410_s9 }
  0x2a   : > { %s400_s11 = scalar_lea.sflag [#allocation4], %s399_s21  ;;  %p2551_p7 = pneg %p2916_p0 }
  0x2d   : > { %s2912_s14 = scalar_lea.hbm %s3388_s0, %s2173_s12  ;;  %s2554_s15 = scalar_lea.hbm %s3388_s0, 256 }
  0x2e   : > { %s2549_s12 = scalar_lea.hbm %s2912_s14, 128  ;;  %p2555_p8 = scmp.lt.u32.totalorder %s2912_s14, %s3388_s0 }
  0x2f   : > { %p2550_p5 = scmp.ne.s32.totalorder %s2912_s14, %s2549_s12  ;;  %p2556_p11 = scmp.lt.u32.totalorder %s2554_s15, %s2549_s12 }
  0x30   : > { %p2558_p3 = scmp.lt.u32.totalorder %s2549_s12, %s2912_s14 }
  0x31   : > { %p2552_p4 = pnand %p2551_p7, %p2550_p5  ;;  %p2557_p1 = por %p2556_p11, %p2555_p8 }
  0x33   : > { %p2553_p9 = pneg %p2552_p4  ;;  %p2559_p13 = por %p2558_p3, %p2557_p1 }
  0x35   : > { %p2560_p12 = pnand %p2559_p13, %p2553_p9 }
  0x37   : > { %2563 = shalt.err (!%p2560_p12)
}
  0x38   : > { %s2564_s21 = scalar_lea.vmem %s2920_s9, 128  ;;  %s2737_s28 = smov [#allocation3]  }
  0x39   : > { %p2565_p5 = scmp.ne.s32.totalorder %s2920_s9, %s2564_s21  ;;  %s2569_s18 = sshll.u32 %s2737_s28, 4  ;;  %s2570_s18 = int_to_ptr.vmem [resolvable:$false] %s2569_s18 }
  0x3a   : > { %s2571_s24 = scalar_lea.vmem %s2570_s18, 256  ;;  %p2572_p6 = scmp.lt.s32.totalorder %s2920_s9, %s2570_s18 }
  0x3b   : > { %p2567_p4 = pnand %p2565_p5, %p2551_p7  ;;  %p2573_p8 = scmp.lt.s32.totalorder %s2571_s24, %s2564_s21 }
  0x3d   : > { %p2568_p10 = pneg %p2567_p4  ;;  %p2574_p11 = por %p2573_p8, %p2572_p6 }
  0x3f   : > { %p2575_p3 = pnand %p2574_p11, %p2568_p10 }
  0x41   : > { %2578 = shalt.err (!%p2575_p3)
}
  0x42   : > { %2417 = dma.hbm_to_vmem [thread:$0]  (!%p2916_p0), %s2912_s14, 128, %s2920_s9, %s400_s11  }
  0x43   : > { %p502_p12 = scmp.lt.s32.totalorder %s2735_s13, 5  ;;  %s154_s12 = sadd.s32 1, %s2703_s23 }
  0x44   : > { %p3391_p13 = scmp.ge.s32.totalorder %s2735_s13, 1  ;;  %s40_s16 = sadd.s32 1, %s2727_s29 }
  0x45   : > { %s437_s20 = sand.u32 1, %s2703_s23   ;;  %p41_p10 = scmp.ge.s32.totalorder %s40_s16, 2 }
  0x46   : > { %p2958_p6 = pnand %p3391_p13, %p502_p12  ;;  %s2174_s21 = sshll.u32 %s437_s20, 6 }
  0x47   : > { %s2226_s28 = sshll.u32 %s2727_s29, 10  ;;  %s3434_s16 = smov (%p41_p10, %s40_s16), 0 }
  0x48   : > { %3393 = sst [smem:[#allocation23_spill]] %s3434_s16  ;;  %s3394_s18 = sadd.s32 1, %s2731_s30 }
  0x49   : > { %s3436_s18 = smov (!%p41_p10, %s3394_s18), %s2731_s30  ;;  %s151_s9 = ssub.s32 %s2727_s29, %s3434_s16 }
  0x4a   : > { %p45_p0 = scmp.ge.s32.totalorder %s3436_s18, 2  ;;  %p152_p7 = scmp.eq.s32.totalorder %s151_s9, 0 }
  0x4b   : > { %s3395_s4 = sld [smem:[#allocation30_spill]]  ;;  %s441_s0 = scalar_lea.vmem [#allocation6], %s2174_s21 }
  0x4c   : > { %s448_s13 = sshll.u32 %s441_s0, 4  ;;  %s3438_s18 = smov (%p45_p0, %s3436_s18), 0  ;;  %s2984_s13 = int_to_ptr.vmem [resolvable:$true] %s448_s13 }
  0x4d   : > { %3396 = sst [smem:[#allocation24_spill]] %s3438_s18  ;;  %s47_s16 = ssub.s32 %s2731_s30, %s3438_s18 }
  0x4e   : > { %s2980_s8 = scalar_select %p152_p7, %s2703_s23, %s154_s12  }
  0x4f   : > { %p48_p9 = scmp.eq.s32.totalorder %s47_s16, 0  ;;  %s3398_s9 = sadd.s32 1, %s2715_s26 }
  0x50   : > { %3397 = sst [smem:[#allocation25_spill]] %s2980_s8  ;;  %p2581_p5 = pneg %p2924_p2 }
  0x51   : > { %s2975_s24 = scalar_lea.hbm %s3395_s4, %s2226_s28  ;;  %s2991_s28 = scalar_lea.sflag [#allocation7], %s437_s20 }
  0x52   : > { %s2989_s29 = scalar_select %p48_p9, %s2715_s26, %s3398_s9  }
  0x53   : > { %s2579_s14 = scalar_lea.hbm %s2975_s24, 1024  ;;  %s2584_s21 = scalar_lea.hbm %s3395_s4, 2048 }
  0x54   : > { %3399 = sst [smem:[#allocation26_spill]] %s2989_s29  ;;  %p2580_p1 = scmp.ne.s32.totalorder %s2975_s24, %s2579_s14 }
  0x55   : > { %p2585_p11 = scmp.lt.u32.totalorder %s2975_s24, %s3395_s4  ;;  %p2586_p3 = scmp.lt.u32.totalorder %s2584_s21, %s2579_s14 }
  0x56   : > { %p2582_p4 = pnand %p2581_p5, %p2580_p1  ;;  %p2588_p13 = scmp.lt.u32.totalorder %s2579_s14, %s2975_s24 }
  0x57   : > { %p2587_p12 = por %p2586_p3, %p2585_p11 }
  0x58   : > { %p2583_p8 = pneg %p2582_p4 }
  0x59   : > { %p2589_p10 = por %p2588_p13, %p2587_p12 }
  0x5b   : > { %p2590_p0 = pnand %p2589_p10, %p2583_p8 }
  0x5d   : > { %2593 = shalt.err (!%p2590_p0)
}
  0x5e   : > { %s2594_s16 = scalar_lea.vmem %s2984_s13, 1024  ;;  %s2738_s20 = smov [#allocation6]  }
  0x5f   : > { %p2595_p7 = scmp.ne.s32.totalorder %s2984_s13, %s2594_s16  ;;  %s2599_s9 = sshll.u32 %s2738_s20, 4  ;;  %s2600_s9 = int_to_ptr.vmem [resolvable:$false] %s2599_s9 }
  0x60   : > { %s2601_s18 = scalar_lea.vmem %s2600_s9, 2048  ;;  %p2602_p4 = scmp.lt.s32.totalorder %s2984_s13, %s2600_s9 }
  0x61   : > { %p2597_p9 = pnand %p2595_p7, %p2581_p5  ;;  %p2603_p11 = scmp.lt.s32.totalorder %s2601_s18, %s2594_s16 }
  0x63   : > { %p2598_p1 = pneg %p2597_p9  ;;  %p2604_p3 = por %p2603_p11, %p2602_p4 }
  0x65   : > { %p2605_p12 = pnand %p2604_p3, %p2598_p1 }
  0x67   : > { %2608 = shalt.err (!%p2605_p12)
}
  0x68   : > { %s2739_s14 = smov 128   ;;  %s2740_s0 = smov 8  }
  0x69   : > { %2420 = dma.hbm_to_vmem [thread:$0]  (!%p2924_p2), %s2975_s24, 1024, %s2984_s13, %s2991_s28, %s2739_s14, %s2739_s14, %s2740_s0  }
  0x6a   : > { %506 = sbr.rel (%p2958_p6) target bundleno = 3810 (0xee2), region = 68 }
  0x71   : > { %s3022_s12 = sand.u32 1, %s2711_s25   ;;  %p3401_p5 = scmp.ne.s32.totalorder %s3381_s19, 0 }
  0x72   : > { %3400 = sst [smem:[#allocation27_spill]] %s3022_s12  ;;  %s2178_s21 = sshll.u32 %s3022_s12, 3 }
  0x73   : > { %s509_s11 = scalar_lea.sflag [#allocation4], %s3022_s12  ;;  %s512_s16 = scalar_lea.vmem [#allocation3], %s2178_s21 }
  0x74   : > { %2682 = dma.done.wait (%p3401_p5), %s509_s11, 128  }
  0x75   : > { %2684 = vsyncadd (%p3401_p5), %s509_s11, 4294967168  ;;  %s517_s13 = sand.u32 1, %s2699_s22   ;;  %p3402_p2 = scmp.ne.s32.totalorder %s3383_s17, 0 }
  0x76   : > { %s2179_s10 = sshll.u32 %s517_s13, 6  ;;  %s518_s15 = scalar_lea.sflag [#allocation7], %s517_s13 }
  0x77   : > { %s3031_s24 = scalar_lea.vmem [#allocation6], %s2179_s10 }
  0x78   : > { %2686 = dma.done.wait (%p3402_p2), %s518_s15, 1024  }
  0x79   : > { %2688 = vsyncadd (%p3402_p2), %s518_s15, 4294966272  ;;  %p603_p6 = scmp.lt.s32.totalorder %s2719_s27, 1  ;;  %s3403_s3 = sld [smem:[#allocation29_spill]] }
  0x7a   : > { %s3404_s8 = sld [smem:[#allocation31_spill]]  ;;  %s3405_s10 = sld [smem:[#allocation32_spill]] }
  0x7b   : > { %s3039_s28 = scalar_select %p603_p6, %s2719_s27, 1 }
  0x7c   : > { %s3406_s22 = sld [smem:[#allocation33_spill]]  ;;  %s3407_s29 = sld [smem:[#allocation34_spill]] }
  0x7d   : > { %s2227_s0 = sshll.u32 %s3039_s28, 6  ;;  %s622_s25 = scalar_lea.vmem %s3338_s7, %s3039_s28 }
  0x7e   : > { %s2228_s17 = sshll.u32 %s3039_s28, 5  ;;  %s3086_s9 = scalar_lea.vmem [#allocation8], %s2178_s21 }
  0x7f   : > { %s3057_s20 = scalar_lea.vmem %s3403_s3, %s2227_s0  ;;  %p2187_p8 = scmp.ne.s32.totalorder %s2719_s27, 0 }
  0x80   : > { %s3071_s23 = scalar_lea.vmem %s3404_s8, %s2228_s17  ;;  %s630_s15 = scalar_lea.vmem %s3405_s10, %s3039_s28  ;;  %v643_v0 = vld [vmem:[%s512_s16] sm:$0xff] (!%p2187_p8)  ;;  %vm644_vm0 = vcmask (!%p2187_p8), 261120  }
  0x81   : > { %642 = sbr.rel (%p2187_p8) target bundleno = 136 (0x88), region = 80  ;;  %645 = vst.msk [vmem:[#allocation2] sm:$0xff] (!%p2187_p8), %vm644_vm0, %v643_v0 }
  0x82   : > { %s3080_s12 = scalar_lea.vmem %s3406_s22, %s2227_s0  ;;  %s638_s26 = scalar_lea.vmem %s3407_s29, %s3039_s28 }
  0x88 PF: > { %v3089_v1 = vld [vmem:[#allocation2] sm:$0xff]  ;;  %vm649_vm1 = vcmask 261120   ;;  %v679_v8 = vld [vmem:[%s3057_s20 + $0x8] sm:$0xff]  ;;  %v681_v9 = vld [vmem:[%s3057_s20 + $0x18] sm:$0xff]  ;;  %v2741_v15 = vmov 0.0   ;;  %s3408_s22 = scalar_lea.vmem %s3332_s1, %s3039_s28  ;;  %s3409_s16 = scalar_lea.vmem %s3333_s2, %s3039_s28  ;;  %vm2742_vm2 = vmmov 0  }
  0x89   : > { %v650_v2 = vsel %vm649_vm1, %v3089_v1, 0.0  ;;  %v678_v10 = vld [vmem:[%s3057_s20] sm:$0xff]  ;;  %v2370_v11 = vpack.c.bf16 %v681_v9, %v679_v8  ;;  %v680_v12 = vld [vmem:[%s3057_s20 + $0x10] sm:$0xff]  ;;  %v683_v13 = vld [vmem:[%s3057_s20 + $0x28] sm:$0xff]  ;;  %753 = vmatprep.mubr.f32.mxu0 %v2741_v15  ;;  %2277 = vmatprep.subr.mxu1 %v2741_v15  ;;  %s2743_s14 = smov 112   ;;  %s2744_s0 = smov 64  }
  0x8a   : > { %651 = vadd.xlane.f32.xlu0 %v650_v2  ;;  %v685_v14 = vld [vmem:[%s3057_s20 + $0x38] sm:$0xff]  ;;  %v2372_v16 = vpack.c.bf16 %v680_v12, %v678_v10  ;;  %v682_v18 = vld [vmem:[%s3057_s20 + $0x20] sm:$0xff]  ;;  %v684_v19 = vld [vmem:[%s3057_s20 + $0x30] sm:$0xff]  ;;  %2279 = vmatprep.mubr.msk.f32.mxu1 %vm2742_vm2, %v2741_v15  ;;  %s2745_s10 = smov 48   ;;  %vm763_vm3 = vcmask 130048   ;;  %vm838_vm4 = vcmask 64512   ;;  %s3410_s19 = scalar_lea.vmem %s3336_s5, %s3039_s28 }
  0x8b   : > { %v2374_v17 = vpack.c.bf16 %v685_v14, %v683_v13  ;;  %2371 = vmatprep.subr.bf16.mxu0 %v2370_v11  ;;  %v2376_v20 = vpack.c.bf16 %v684_v19, %v682_v18  ;;  %v2188_v25 = vld [vmem:[%s3408_s22] ss:$0 sm:$0xff]  ;;  %s2746_s20 = smov 32   ;;  %s2747_s17 = smov 96   ;;  %v2197_v51 = vld [vmem:[%s3031_s24 + $0x10] sm:$0xff]  ;;  %v2198_v52 = vld [vmem:[%s3031_s24 + $0x18] sm:$0xff] }
  0x8c   : > { %2373 = vmatpush1.bf16.msra.mxu0 %v2372_v16  ;;  %v2189_v27 = vld [vmem:[%s3409_s16] ss:$0 sm:$0xff]  ;;  %v2748_v53 = vmov 0.0|0.0   ;;  %v2379_v54 = vpack.c.bf16 %v2198_v52, %v2197_v51  ;;  %v923_v59 = vld [vmem:[%s3031_s24] sm:$0xff]  ;;  %s2749_s18 = smov 80   ;;  %s2750_s11 = smov 16  }
  0x8d   : > { %2375 = vmatprep.subr.bf16.mxu0 %v2374_v17  ;;  %v924_v60 = vld [vmem:[%s3031_s24 + $0x8] sm:$0xff]  ;;  %s3411_s3 = scalar_lea.vmem %s3337_s6, %s3039_s28  ;;  %vm1866_vm5 = vcmask 523264   ;;  %p2220_p13 = scmp.ge.s32.totalorder %s2719_s27, 1 }
  0x8e   : > { %v2382_v63 = vpack.c.bf16 %v924_v60, %v923_v59 }
  0x90   : > { %2377 = vmatpush1.bf16.msra.mxu0 %v2376_v20 }
  0x91   : > { %2272 = vmatprep.subr.mxu0 %v2741_v15 }
 0x117   : > { %v652_v3 = vpop.xlane.xlu0 %651 }
 0x118   : > { %v654_v4 = vmul.f32 0.03125, %v652_v3 }
 0x11a   : > { %v655_v5 = vsub.f32 %v3089_v1, %v654_v4 }
 0x11c   : > { %v656_v6 = vmul.f32 %v655_v5, %v655_v5 }
 0x11e   : > { %v657_v7 = vsel %vm649_vm1, %v656_v6, 0.0 }
 0x11f   : > { %658 = vadd.xlane.f32.xlu0 %v657_v7 }
 0x1ac   : > { %v659_v21 = vpop.xlane.xlu0 %658 }
 0x1ad   : > { %v660_v22 = vmul.f32 0.03125, %v659_v21 }
 0x1af   : > { %v661_v23 = vadd.f32 1e-05, %v660_v22 }
 0x1b1   : > { %2527 = vrsqrt.f32 %v661_v23  ;;  %v2204_v23 = vld [vmem:[%s3031_s24 + $0x20] sm:$0xff] }
 0x1bb   : > { %v2528_v24 = vpop.eup %2527 }
 0x1bc   : > { %v663_v26 = vmul.f32 %v2528_v24, %v655_v5  ;;  %v2205_v24 = vld [vmem:[%s3031_s24 + $0x28] sm:$0xff] }
 0x1be   : > { %v670_v28 = vmul.f32 %v2188_v25, %v663_v26  ;;  %v2385_v25 = vpack.c.bf16 %v2205_v24, %v2204_v23  ;;  %v1855_v23 = vld [vmem:[%s3080_s12 + $0x20] sm:$0xff]  ;;  %v1856_v24 = vld [vmem:[%s3080_s12 + $0x28] sm:$0xff] }
 0x1c0   : > { %v677_v29 = vadd.f32 %v2189_v27, %v670_v28 }
 0x1c2   : > { %2190 = vmatmul.mubr.msk.f32.vlgmr.msra.gmra.mrb[0].mxu0 %vm649_vm1, %v677_v29 }
 0x1c3   : > { %2274 = vmatprep.mubr.msk.f32.mxu0 %vm2742_vm2, %v2741_v15 }
 0x295   : > { %v3121_v30 = vpop.f32.mrb[0].mxu0 }
 0x296   : > { %925 = vrot.lane.b32.xlu0 %v3121_v30, %s2743_s14  ;;  %761 = vrot.lane.b32.xlu1 %v3121_v30, %s2744_s0  ;;  %v3126_v31 = vpop.f32.mrb[1].mxu0 }
 0x297   : > { %2278 = vmatpush3.msra.mxu1 %v3126_v31 }
 0x298   : > { %2287 = vmatprep.subr.mxu1 %v2741_v15 }
 0x29a   : > { %927 = vrot.lane.b32.xlu1 %v3121_v30, %s2745_s10 }
 0x308   : > { %v762_v32 = vpop.permute.xlu1 %761  ;;  %v926_v34 = vpop.permute.xlu0 %925 }
 0x309   : > { %2273 = vmatpush3.xpose.msk.msra.mxu0 %vm763_vm3, %v762_v32 }
 0x30a   : > { %2282 = vmatprep.subr.mxu0 %v2741_v15 }
 0x30c   : > { %2275 = vmatmul.mubr.msk.f32.vlgmr.msra.gmra.mrb[2].mxu0 %vm763_vm3, %v3121_v30  ;;  %v928_v33 = vpop.permute.xlu1 %927 }
 0x30d   : > { %2283 = vmatpush3.xpose.msk.msra.mxu0 %vm763_vm3, %v928_v33  ;;  %2284 = vmatprep.mubr.msk.f32.mxu0 %vm2742_vm2, %v2741_v15 }
 0x30e   : > { %2378 = vmatprep.subr.bf16.mxu0 %v2748_v53 }
 0x310   : > { %2285 = vmatmul.mubr.msk.f32.vlgmr.msra.gmra.mrb[4].mxu0 %vm763_vm3, %v926_v34 }
 0x311   : > { %2296 = vmatprep.mubr.msk.f32.mxu0 %vm2742_vm2, %v2741_v15  ;;  %2380 = vmatpush3.bf16.msra.mxu0 %v2379_v54 }
 0x312   : > { %2306 = vmatprep.subr.mxu0 %v2741_v15 }
 0x3df   : > { %v834_v35 = vpop.f32.mrb[2].mxu0 }
 0x3e0   : > { %v2276_v36 = vpop.f32.mrb[3].mxu0  ;;  %v839_v37 = vsel %vm838_vm4, %v834_v35, -inf }
 0x3e1   : > { %840 = vmax.xlane.f32.xlu1 %v839_v37 }
 0x3e3   : > { %v999_v38 = vpop.f32.mrb[4].mxu0 }
 0x3e4   : > { %v2286_v39 = vpop.f32.mrb[5].mxu0  ;;  %v1003_v40 = vsel %vm838_vm4, %v999_v38, -inf }
 0x3e5   : > { %1004 = vmax.xlane.f32.xlu0 %v1003_v40 }
 0x3fb   : > { %1242 = vrot.lane.b32.xlu0 %v3121_v30, %s2746_s20 }
 0x46e   : > { %v841_v41 = vpop.xlane.xlu1 %840 }
 0x46f   : > { %v842_v42 = vsub.f32 %v834_v35, %v841_v41 }
 0x471   : > { %v843_v43 = vmul.f32 1.442695, %v842_v42 }
 0x472   : > { %v1005_v44 = vpop.xlane.xlu0 %1004 }
 0x473   : > { %2529 = vpow2.f32 %v843_v43  ;;  %v1006_v45 = vsub.f32 %v999_v38, %v1005_v44  ;;  %v2210_v43 = vld [vmem:[%s3031_s24 + $0x30] sm:$0xff]  ;;  %v2211_v44 = vld [vmem:[%s3031_s24 + $0x38] sm:$0xff] }
 0x475   : > { %v1007_v46 = vmul.f32 1.442695, %v1006_v45  ;;  %v2388_v45 = vpack.c.bf16 %v2211_v44, %v2210_v43 }
 0x476   : > { %v1243_v5 = vpop.permute.xlu0 %1242 }
 0x477   : > { %2531 = vpow2.f32 %v1007_v46 }
 0x47d   : > { %v2530_v47 = vpop.eup %2529 }
 0x47e   : > { %v845_v48 = vsel %vm838_vm4, %v2530_v47, 0.0 }
 0x47f   : > { %846 = vadd.xlane.f32.xlu1 %v845_v48 }
 0x481   : > { %v2532_v49 = vpop.eup %2531 }
 0x482   : > { %v1009_v50 = vsel %vm838_vm4, %v2532_v49, 0.0 }
 0x483   : > { %1010 = vadd.xlane.f32.xlu1 %v1009_v50 }
 0x494   : > { %1015 = vrot.lane.b32.xlu1 %v3126_v31, %s2743_s14 }
 0x498   : > { %1240 = vrot.lane.b32.xlu1 %v3121_v30, %s2747_s17 }
 0x50c   : > { %v847_v55 = vpop.xlane.xlu1 %846 }
 0x50d   : > { %2533 = vrcp.f32 %v847_v55  ;;  %v2213_v55 = vld [vmem:[%s3410_s19] ss:$0 sm:$0xff] }
 0x510   : > { %v1011_v56 = vpop.xlane.xlu1 %1010 }
 0x511   : > { %2535 = vrcp.f32 %v1011_v56 }
 0x514   : > { %v1016_v61 = vpop.permute.xlu1 %1015 }
 0x517   : > { %v2534_v57 = vpop.eup %2533 }
 0x518   : > { %v849_v58 = vmul.f32 %v2534_v57, %v2530_v47  ;;  %v1241_v7 = vpop.permute.xlu1 %1240 }
 0x51a   : > { %2280 = vmatmul.mubr.msk.f32.vlgmr.msra.gmra.mrb[0].mxu1 %vm838_vm4, %v849_v58 }
 0x51b   : > { %v2536_v62 = vpop.eup %2535  ;;  %2288 = vmatpush3.msra.mxu1 %v1016_v61  ;;  %2289 = vmatprep.mubr.msk.f32.mxu1 %vm2742_vm2, %v2741_v15 }
 0x51c   : > { %v1013_v0 = vmul.f32 %v2536_v62, %v2532_v49  ;;  %2381 = vmatprep.subr.bf16.mxu1 %v2748_v53 }
 0x51e   : > { %2290 = vmatmul.mubr.msk.f32.vlgmr.msra.gmra.mrb[2].mxu1 %vm838_vm4, %v1013_v0 }
 0x51f   : > { %2383 = vmatpush3.bf16.msra.mxu1 %v2382_v63  ;;  %2303 = vmatprep.mubr.msk.f32.mxu1 %vm2742_vm2, %v2741_v15 }
 0x520   : > { %2311 = vmatprep.subr.mxu1 %v2741_v15 }
 0x5ed   : > { %v919_v2 = vpop.f32.mrb[0].mxu1 }
 0x5ee   : > { %v2281_v3 = vpop.f32.mrb[1].mxu1  ;;  %2304 = vmatmul.mubr.msk.f32.vlgmr.msra.gmra.mrb[4].mxu1 %vm763_vm3, %v919_v2  ;;  %v1762_v2 = vld [vmem:[%s3071_s23] sm:$0xff] }
 0x5ef   : > { %2313 = vmatprep.mubr.msk.f32.mxu1 %vm2742_vm2, %v2741_v15  ;;  %v1763_v3 = vld [vmem:[%s3071_s23 + $0x8] sm:$0xff] }
 0x5f1   : > { %v1087_v4 = vpop.f32.mrb[2].mxu1 }
 0x5f2   : > { %v2291_v6 = vpop.f32.mrb[3].mxu1  ;;  %2297 = vmatmul.mubr.msk.f32.vlgmr.msra.gmra.mrb[6].mxu0 %vm763_vm3, %v1087_v4  ;;  %v2391_v4 = vpack.c.bf16 %v1763_v3, %v1762_v2 }
 0x5f3   : > { %2307 = vmatpush3.xpose.msk.msra.mxu0 %vm763_vm3, %v1243_v5  ;;  %2308 = vmatprep.mubr.msk.f32.mxu0 %vm2742_vm2, %v2741_v15  ;;  %v1765_v5 = vld [vmem:[%s3071_s23 + $0x18] sm:$0xff] }
 0x5f4   : > { %2384 = vmatprep.subr.bf16.mxu0 %v2748_v53 }
 0x5f6   : > { %2309 = vmatmul.mubr.msk.f32.vlgmr.msra.gmra.mrb[8].mxu0 %vm763_vm3, %v1241_v7 }
 0x5f7   : > { %2320 = vmatprep.mubr.msk.f32.mxu0 %vm2742_vm2, %v2741_v15  ;;  %2386 = vmatpush3.bf16.msra.mxu0 %v2385_v25  ;;  %v2403_v25 = vpack.c.bf16 %v1856_v24, %v1855_v23 }
 0x5f8   : > { %2328 = vmatprep.subr.mxu0 %v2741_v15 }
 0x6c1   : > { %v1236_v8 = vpop.f32.mrb[4].mxu1 }
 0x6c2   : > { %v2305_v9 = vpop.f32.mrb[5].mxu1 }
 0x6c5   : > { %v1163_v10 = vpop.f32.mrb[6].mxu0 }
 0x6c6   : > { %v3175_v11 = vadd.f32 %v1236_v8, %v1163_v10  ;;  %v2298_v12 = vpop.f32.mrb[7].mxu0 }
 0x6c9   : > { %v1314_v13 = vpop.f32.mrb[8].mxu0 }
 0x6ca   : > { %v2310_v14 = vpop.f32.mrb[9].mxu0  ;;  %v1318_v16 = vsel %vm838_vm4, %v1314_v13, -inf }
 0x6cb   : > { %1319 = vmax.xlane.f32.xlu1 %v1318_v16 }
 0x6dc   : > { %1329 = vrot.lane.b32.xlu1 %v3126_v31, %s2747_s17 }
 0x6e0   : > { %1482 = vrot.lane.b32.xlu1 %v3121_v30, %s2749_s18 }
 0x758   : > { %v1320_v17 = vpop.xlane.xlu1 %1319 }
 0x759   : > { %v1321_v18 = vsub.f32 %v1314_v13, %v1320_v17  ;;  %v2215_v13 = vld [vmem:[%s622_s25] ss:$0 sm:$0xff] }
 0x75a   : > { %v1851_v17 = vld [vmem:[%s3080_s12] sm:$0xff] }
 0x75b   : > { %v1322_v19 = vmul.f32 1.442695, %v1321_v18  ;;  %v1852_v18 = vld [vmem:[%s3080_s12 + $0x8] sm:$0xff] }
 0x75c   : > { %v1330_v20 = vpop.permute.xlu1 %1329 }
 0x75d   : > { %2537 = vpow2.f32 %v1322_v19  ;;  %2312 = vmatpush3.msra.mxu1 %v1330_v20  ;;  %v2397_v19 = vpack.c.bf16 %v1852_v18, %v1851_v17  ;;  %v1853_v20 = vld [vmem:[%s3080_s12 + $0x10] sm:$0xff] }
 0x75e   : > { %2323 = vmatprep.subr.mxu1 %v2741_v15 }
 0x767   : > { %v2538_v21 = vpop.eup %2537 }
 0x768   : > { %v1324_v22 = vsel %vm838_vm4, %v2538_v21, 0.0 }
 0x769   : > { %1325 = vadd.xlane.f32.xlu0 %v1324_v22 }
 0x77f   : > { %1484 = vrot.lane.b32.xlu0 %v3121_v30, %s2750_s11  ;;  %v1483_v30 = vpop.permute.xlu1 %1482 }
 0x7f6   : > { %v1326_v26 = vpop.xlane.xlu0 %1325 }
 0x7f7   : > { %2539 = vrcp.f32 %v1326_v26  ;;  %v1857_v26 = vld [vmem:[%s3080_s12 + $0x30] sm:$0xff] }
 0x7fa   : > { %v1485_v29 = vpop.permute.xlu0 %1484 }
 0x801   : > { %v2540_v27 = vpop.eup %2539 }
 0x802   : > { %v1328_v28 = vmul.f32 %v2540_v27, %v2538_v21  ;;  %v1854_v21 = vld [vmem:[%s3080_s12 + $0x18] sm:$0xff] }
 0x803   : > { %v2400_v22 = vpack.c.bf16 %v1854_v21, %v1853_v20  ;;  %v1858_v27 = vld [vmem:[%s3080_s12 + $0x38] sm:$0xff] }
 0x804   : > { %2314 = vmatmul.mubr.msk.f32.vlgmr.msra.gmra.mrb[6].mxu1 %vm838_vm4, %v1328_v28  ;;  %v2406_v28 = vpack.c.bf16 %v1858_v27, %v1857_v26 }
 0x805   : > { %2324 = vmatpush3.xpose.msk.msra.mxu1 %vm763_vm3, %v1485_v29  ;;  %2325 = vmatprep.mubr.msk.f32.mxu1 %vm2742_vm2, %v2741_v15  ;;  %v2216_v29 = vld [vmem:[%s630_s15] ss:$0 sm:$0xff] }
 0x806   : > { %2387 = vmatprep.subr.bf16.mxu1 %v2748_v53 }
 0x808   : > { %2326 = vmatmul.mubr.msk.f32.vlgmr.msra.gmra.mrb[8].mxu1 %vm763_vm3, %v1483_v30 }
 0x809   : > { %2337 = vmatprep.mubr.msk.f32.mxu1 %vm2742_vm2, %v2741_v15  ;;  %2389 = vmatpush3.bf16.msra.mxu1 %v2388_v45 }
 0x80a   : > { %2396 = vmatprep.subr.bf16.mxu1 %v2748_v53 }
 0x8d7   : > { %v1401_v32 = vpop.f32.mrb[6].mxu1 }
 0x8d8   : > { %v2315_v33 = vpop.f32.mrb[7].mxu1  ;;  %2321 = vmatmul.mubr.msk.f32.vlgmr.msra.gmra.mrb[10].mxu0 %vm763_vm3, %v1401_v32 }
 0x8d9   : > { %2330 = vmatprep.mubr.msk.f32.mxu0 %vm2742_vm2, %v2741_v15 }
 0x8db   : > { %v1556_v34 = vpop.f32.mrb[8].mxu1 }
 0x8dc   : > { %v2327_v35 = vpop.f32.mrb[9].mxu1  ;;  %v1560_v36 = vsel %vm838_vm4, %v1556_v34, -inf }
 0x8dd   : > { %1561 = vmax.xlane.f32.xlu1 %v1560_v36 }
 0x8ee   : > { %1571 = vrot.lane.b32.xlu1 %v3126_v31, %s2749_s18 }
 0x96a   : > { %v1562_v37 = vpop.xlane.xlu1 %1561 }
 0x96b   : > { %v1563_v38 = vsub.f32 %v1556_v34, %v1562_v37 }
 0x96d   : > { %v1564_v39 = vmul.f32 1.442695, %v1563_v38  ;;  %v2218_v38 = vld [vmem:[%s638_s26] ss:$0 sm:$0xff] }
 0x96e   : > { %v1572_v40 = vpop.permute.xlu1 %1571 }
 0x96f   : > { %2541 = vpow2.f32 %v1564_v39  ;;  %2329 = vmatpush3.msra.mxu0 %v1572_v40 }
 0x970   : > { %2390 = vmatprep.subr.bf16.mxu0 %v2748_v53 }
 0x979   : > { %v2542_v41 = vpop.eup %2541 }
 0x97a   : > { %v1566_v42 = vsel %vm838_vm4, %v2542_v41, 0.0 }
 0x97b   : > { %1567 = vadd.xlane.f32.xlu0 %v1566_v42 }
 0x9ab   : > { %v1477_v31 = vpop.f32.mrb[10].mxu0 }
 0x9ac   : > { %v1481_v46 = vadd.f32 %v1477_v31, %v3175_v11  ;;  %v2322_v47 = vpop.f32.mrb[11].mxu0  ;;  %v2214_v11 = vld [vmem:[%s3411_s3] ss:$0 sm:$0xff] }
 0xa08   : > { %v1568_v48 = vpop.xlane.xlu0 %1567 }
 0xa09   : > { %2543 = vrcp.f32 %v1568_v48 }
 0xa13   : > { %v2544_v49 = vpop.eup %2543 }
 0xa14   : > { %v1570_v50 = vmul.f32 %v2544_v49, %v2542_v41 }
 0xa16   : > { %2331 = vmatmul.mubr.msk.f32.vlgmr.msra.gmra.mrb[12].mxu0 %vm838_vm4, %v1570_v50 }
 0xa17   : > { %2348 = vmatprep.mubr.msk.f32.mxu0 %vm2742_vm2, %v2741_v15  ;;  %2392 = vmatpush3.bf16.msra.mxu0 %v2391_v4 }
 0xa18   : > { %2393 = vmatprep.subr.bf16.mxu0 %v2748_v53 }
 0xae9   : > { %v1643_v51 = vpop.f32.mrb[12].mxu0 }
 0xaea   : > { %v2332_v52 = vpop.f32.mrb[13].mxu0  ;;  %2338 = vmatmul.mubr.msk.f32.vlgmr.msra.gmra.mrb[10].mxu1 %vm763_vm3, %v1643_v51 }
 0xaeb   : > { %2367 = vmatprep.mubr.msk.f32.mxu1 %vm2742_vm2, %v2741_v15  ;;  %2398 = vmatpush3.bf16.msra.mxu1 %v2397_v19 }
 0xaec   : > { %2399 = vmatprep.subr.bf16.mxu1 %v2748_v53 }
 0xaef   : > { %2401 = vmatpush3.bf16.msra.mxu1 %v2400_v22 }
 0xaf0   : > { %2402 = vmatprep.subr.bf16.mxu1 %v2748_v53 }
 0xaf3   : > { %2404 = vmatpush3.bf16.msra.mxu1 %v2403_v25 }
 0xaf4   : > { %2405 = vmatprep.subr.bf16.mxu1 %v2748_v53 }
 0xaf7   : > { %2407 = vmatpush3.bf16.msra.mxu1 %v2406_v28 }
 0xbbd   : > { %v1719_v54 = vpop.f32.mrb[10].mxu1 }
 0xbbe   : > { %v1723_v56 = vadd.f32 %v1719_v54, %v1481_v46  ;;  %v2339_v57 = vpop.f32.mrb[11].mxu1 }
 0xbc0   : > { %v1731_v58 = vadd.f32 %v2213_v55, %v1723_v56 }
 0xbc2   : > { %v3220_v59 = vadd.f32 %v1731_v58, %v3089_v1  ;;  %v1764_v1 = vld [vmem:[%s3071_s23 + $0x10] sm:$0xff] }
 0xbc3   : > { %v2394_v6 = vpack.c.bf16 %v1765_v5, %v1764_v1 }
 0xbc4   : > { %v1735_v60 = vsel %vm649_vm1, %v3220_v59, 0.0 }
 0xbc5   : > { %1736 = vadd.xlane.f32.xlu0 %v1735_v60  ;;  %2395 = vmatpush3.bf16.msra.mxu0 %v2394_v6 }
 0xc52   : > { %v1737_v15 = vpop.xlane.xlu0 %1736 }
 0xc53   : > { %v1738_v61 = vmul.f32 0.03125, %v1737_v15 }
 0xc55   : > { %v1739_v62 = vsub.f32 %v3220_v59, %v1738_v61 }
 0xc57   : > { %v1740_v63 = vmul.f32 %v1739_v62, %v1739_v62 }
 0xc59   : > { %v1741_v0 = vsel %vm649_vm1, %v1740_v63, 0.0 }
 0xc5a   : > { %1742 = vadd.xlane.f32.xlu0 %v1741_v0 }
 0xce7   : > { %v1743_v7 = vpop.xlane.xlu0 %1742 }
 0xce8   : > { %v1744_v8 = vmul.f32 0.03125, %v1743_v7 }
 0xcea   : > { %v1745_v9 = vadd.f32 1e-05, %v1744_v8 }
 0xcec   : > { %2545 = vrsqrt.f32 %v1745_v9 }
 0xcf6   : > { %v2546_v10 = vpop.eup %2545 }
 0xcf7   : > { %v1747_v12 = vmul.f32 %v2546_v10, %v1739_v62 }
 0xcf9   : > { %v1754_v14 = vmul.f32 %v2214_v11, %v1747_v12 }
 0xcfb   : > { %v1761_v16 = vadd.f32 %v2215_v13, %v1754_v14 }
 0xcfd   : > { %2349 = vmatmul.mubr.msk.f32.vlgmr.msra.gmra.mrb[14].mxu0 %vm649_vm1, %v1761_v16 }
 0xdd0   : > { %v1842_v30 = vpop.f32.mrb[14].mxu0 }
 0xdd1   : > { %v1843_v32 = vadd.f32 %v2216_v29, %v1842_v30  ;;  %v2350_v33 = vpop.f32.mrb[15].mxu0 }
 0xdd3   : > { %v1847_v34 = vmul.f32 0.70710677, %v1843_v32  ;;  %v1846_v36 = vmul.f32 0.5, %v1843_v32 }
 0xdd5   : > { %2547 = verf.f32 %v1847_v34 }
 0xddf   : > { %v2548_v35 = vpop.eup %2547 }
 0xde0   : > { %v1849_v37 = vadd.f32 1.0, %v2548_v35 }
 0xde2   : > { %v1850_v53 = vmul.f32 %v1849_v37, %v1846_v36 }
 0xde4   : > { %2368 = vmatmul.mubr.msk.f32.vlgmr.msra.gmra.mrb[12].mxu1 %vm1866_vm5, %v1850_v53 }
 0xeb4   : > { %1944 = sbr.rel (%p2220_p13) target bundleno = 3773 (0xebd), region = 84 }
 0xeb7   : > { %v1936_v39 = vpop.f32.mrb[12].mxu1 }
 0xeb8   : > { %v1937_v40 = vadd.f32 %v2218_v38, %v1936_v39  ;;  %v2369_v41 = vpop.f32.mrb[13].mxu1 }
 0xeba   : > { %v1940_v42 = vadd.f32 %v1937_v40, %v3220_v59 }
 0xebc   : > { %1945 = vst.msk [vmem:[#allocation2] sm:$0xff] %vm649_vm1, %v1940_v42 }
 0xebd PF: > { %p2221_p10 = scmp.ne.s32.totalorder %s2719_s27, 1 }
 0xebe   : > { %1950 = vst.msk [vmem:[%s3086_s9] sm:$0xff] (!%p2221_p10), %vm649_vm1, %v1940_v42 }
 0xebf   : > { %1949 = sbr.rel (%p2221_p10) target bundleno = 3782 (0xec6), region = 88 }
 0xec6 PF: > { %s3414_s28 = sld [smem:[#allocation17_spill]]  ;;  %s3415_s15 = sld [smem:[#allocation27_spill]] }
 0xec7   : > { %s3416_s26 = sld [smem:[#allocation21_spill]]  ;;  %s3417_s20 = sld [smem:[#allocation35_spill]] }
 0xec8   : > { %s1965_s18 = sshll.u32 %s3086_s9, 4  ;;  %s2751_s27 = smov [#allocation8]   ;;  %s1966_s18 = int_to_ptr.vmem [resolvable:$true] %s1965_s18 }
 0xec9   : > { %s2609_s24 = scalar_lea.vmem %s1966_s18, 128  ;;  %s2613_s13 = sshll.u32 %s2751_s27, 4  ;;  %s2614_s13 = int_to_ptr.vmem [resolvable:$false] %s2613_s13 }
 0xeca   : > { %p2610_p0 = scmp.ne.s32.totalorder %s1966_s18, %s2609_s24  ;;  %s2615_s19 = scalar_lea.vmem %s2614_s13, 256 }
 0xecb   : > { %p2616_p4 = scmp.lt.s32.totalorder %s1966_s18, %s2614_s13  ;;  %p2617_p11 = scmp.lt.s32.totalorder %s2615_s19, %s2609_s24 }
 0xecc   : > { %s2223_s14 = sshll.u32 %s3414_s28, 7  ;;  %s1952_s11 = scalar_lea.sflag [#allocation5], %s3415_s15 }
 0xecd   : > { %s3273_s17 = scalar_lea.hbm %s3417_s20, %s2223_s14  ;;  %p3418_p7 = scmp.ne.s32.totalorder %s3416_s26, 0 }
 0xece   : > { %p2618_p3 = por %p2617_p11, %p2616_p4 }
 0xecf   : > { %p2611_p9 = pnand %p2610_p0, %p3418_p7 }
 0xed1   : > { %p2612_p1 = pneg %p2611_p9 }
 0xed3   : > { %p2619_p12 = pnand %p2618_p3, %p2612_p1 }
 0xed5   : > { %2622 = shalt.err (!%p2619_p12)
}
 0xed6   : > { %s2623_s9 = scalar_lea.hbm %s3273_s17, 128  ;;  %s2627_s3 = scalar_lea.hbm %s3417_s20, 256 }
 0xed7   : > { %p2624_p5 = scmp.ne.s32.totalorder %s3273_s17, %s2623_s9  ;;  %p2628_p8 = scmp.lt.u32.totalorder %s3273_s17, %s3417_s20 }
 0xed8   : > { %p2629_p13 = scmp.lt.u32.totalorder %s2627_s3, %s2623_s9  ;;  %p2631_p0 = scmp.lt.u32.totalorder %s2623_s9, %s3273_s17 }
 0xed9   : > { %p2625_p2 = pnand %p2624_p5, %p3418_p7 }
 0xeda   : > { %p2630_p10 = por %p2629_p13, %p2628_p8 }
 0xedb   : > { %p2626_p6 = pneg %p2625_p2 }
 0xedc   : > { %p2632_p9 = por %p2631_p0, %p2630_p10 }
 0xede   : > { %p2633_p1 = pnand %p2632_p9, %p2626_p6 }
 0xee0   : > { %2636 = shalt.err (!%p2633_p1)
}
 0xee1   : > { %2412 = dma.vmem_to_hbm [thread:$0]  (%p3418_p7), %s1966_s18, 128, %s3273_s17, %s1952_s11  }
 0xee2 PF: > { %s3419_s23 = sld [smem:[#allocation20_spill]]  ;;  %s3420_s25 = sld [smem:[#allocation14_spill]] }
 0xee3   : > { %s3421_s29 = sld [smem:[#allocation22_spill]] }
 0xee8   : > { %p2426_p4 = scmp.ge.s32.totalorder %s3419_s23, 2  ;;  %s1977_s21 = sand.u32 1, %s3420_s25  }
 0xee9   : > { %p3422_p11 = scmp.ne.s32.totalorder %s3421_s29, 0  ;;  %s1978_s12 = scalar_lea.sflag [#allocation5], %s1977_s21 }
 0xeeb   : > { %p2422_p3 = pnand %p2426_p4, %p3422_p11 }
 0xeed   : > { %2690 = dma.done.wait (!%p2422_p3), %s1978_s12, 128  }
 0xeee   : > { %2692 = vsyncadd (!%p2422_p3), %s1978_s12, 4294967168  ;;  %s31_s13 = sadd.s32 1, %s3419_s23   ;;  %s3423_s21 = sld [smem:[#allocation12_spill]] }
 0xeef   : > { %p28_p12 = scmp.ge.s32.totalorder %s31_s13, 6   ;;  %s3424_s22 = sld [smem:[#allocation13_spill]] }
 0xef0   : > { %s3425_s23 = sld [smem:[#allocation25_spill]]  ;;  %s3426_s24 = sld [smem:[#allocation15_spill]] }
 0xef1   : > { %s3427_s25 = sld [smem:[#allocation16_spill]]  ;;  %s3428_s26 = sld [smem:[#allocation26_spill]] }
 0xef2   : > { %s3429_s27 = sld [smem:[#allocation18_spill]]  ;;  %s3430_s28 = sld [smem:[#allocation19_spill]] }
 0xef3   : > { %s3431_s29 = sld [smem:[#allocation23_spill]]  ;;  %s3432_s30 = sld [smem:[#allocation24_spill]] }
 0xef4   :  { %30 = sbr.rel (!%p28_p12) target bundleno = 20 (0x14), region = 171 }
 0xefb   :  { %1983 = vsyncpa [#allocation4], 1 }
 0xefc   :  { %1985 = vsyncpa [#allocation4 + $0x1], 1 }
 0xefd   :  { %1986 = vsyncpa [#allocation7], 1 }
 0xefe   :  { %1988 = vsyncpa [#allocation7 + $0x1], 1 }
 0xeff   :  { %1989 = vsyncpa [#allocation5], 1 }
 0xf00   :  { %1991 = vsyncpa [#allocation5 + $0x1], 1 }

</bundles_post_ra>
